<compile_context>
chip_gen: v7x
topology: tpu7x:2x2x1
jax: 0.10.0
libtpu: 0.0.40
codegen_flags: <defaults>
</compile_context>

<pallas_src>
import functools

import jax
import jax.numpy as jnp
from jax import lax
from jax.experimental import pallas as pl
from jax.experimental.pallas import tpu as pltpu

_EPS = 1e-5
_NEG_SLOPE = 0.1


def _vmem_limit_bytes():
    """Generation-aware VMEM budget (v5e/v6e: 128 MiB phys, v7x: 64 MiB)."""
    try:
        cap = pltpu.get_tpu_info().vmem_capacity_bytes
        return int(min(cap * 3 // 4, 100 * 1024 * 1024))
    except Exception:
        return 32 * 1024 * 1024          # conservative; fine on all generations


def _pick_tile_h(Ho, Wo, max_rows=2048):
    """Largest divisor t of Ho with t*Wo a multiple of 128 and t*Wo <= max_rows.

    Falls back to the full extent (a full-dim block is always legal)."""
    cands = [t for t in range(1, Ho + 1) if Ho % t == 0 and (t * Wo) % 128 == 0]
    small = [t for t in cands if t * Wo <= max_rows]
    if small:
        return max(small)
    if cands:
        return min(cands)
    return Ho


def _make_conv_kernel(KH, KW, tile_H, Wo, Cin, Cout, bn_act):
    """Conv tile kernel producing a channel-major (Cout, tile_H*Wo) f32 tile.

    bn_act=True : no conv bias, also emit per-tile BN partial sums (f32).
    bn_act=False: add conv bias, output is final.
    """
    rows = tile_H * Wo
    HH = tile_H + KH - 1                       # overlapping row window (halo)

    def conv_tile(x_ref, w_ref):
        r0 = pl.program_id(1) * tile_H
        # One dynamic load of the overlapping row window from the resident
        # (whole padded sample) input block; all tap slicing is on the value.
        xwin = x_ref[0, pl.ds(r0, HH)]                     # (HH, WP, Cin) bf16
        acc = jnp.zeros((Cout, rows), jnp.float32)
        for kh in range(KH):
            for kw in range(KW):
                tap = xwin[kh:kh + tile_H, kw:kw + Wo, :].reshape(rows, Cin)
                # (Cout, Cin) x (rows, Cin) contracted on Cin -> (Cout, rows):
                # channel-major result straight out of the MXU, no transposes.
                acc = acc + lax.dot_general(
                    w_ref[kh * KW + kw], tap,
                    dimension_numbers=(((1,), (1,)), ((), ())),
                    preferred_element_type=jnp.float32)
        return acc                                          # (Cout, rows) f32

    if bn_act:
        def kernel(x_ref, w_ref, y_ref, ssum_ref, ssq_ref):
            acc = conv_tile(x_ref, w_ref)
            y_ref[0] = acc.astype(y_ref.dtype)
            # Per-tile BN partial statistics (from the f32 accumulator).
            ssum_ref[0, 0] = jnp.sum(acc, axis=1, keepdims=True)
            ssq_ref[0, 0] = jnp.sum(acc * acc, axis=1, keepdims=True)
    else:
        def kernel(x_ref, w_ref, b_ref, y_ref):
            acc = conv_tile(x_ref, w_ref) + b_ref[...]      # (Cout,1) bcast
            y_ref[0] = acc.astype(y_ref.dtype)

    return kernel


def _bn_leaky_kernel(y_ref, scale_ref, shift_ref, o_ref):
    """Fused affine BN (pre-folded per-channel scale/shift) + LeakyReLU(0.1)."""
    z = y_ref[...] * scale_ref[...] + shift_ref[...]        # (1,Cout,rows) f32
    o_ref[...] = jnp.where(z >= 0, z, _NEG_SLOPE * z).astype(o_ref.dtype)


@functools.partial(jax.jit, static_argnames=("padding", "bn_act"))
def cnn_block_forward(x_nchw, weight_oihw, bias, gamma, beta,
                      padding: int = 1, bn_act: bool = True):
    """Forward pass of CNNBlock. x_nchw: (N, Cin, H, W) float32. Returns NCHW."""
    N, Cin, H, W = x_nchw.shape
    Cout, _, KH, KW = weight_oihw.shape

    # ---- layout prep: NCHW -> NHWC, spatial zero pad, bf16 MXU operands ----
    x = jnp.transpose(x_nchw, (0, 2, 3, 1))                        # (N,H,W,Cin)
    xp = jnp.pad(x, ((0, 0), (padding, padding), (padding, padding), (0, 0)))
    xp = xp.astype(jnp.bfloat16)
    HP, WP = H + 2 * padding, W + 2 * padding
    Ho, Wo = HP - KH + 1, WP - KW + 1

    # Per-tap weights, pre-transposed to (Cout, Cin) so the kernel's NT matmul
    # yields a channel-major tile directly.
    w_t = jnp.transpose(weight_oihw, (2, 3, 0, 1)).reshape(
        KH * KW, Cout, Cin).astype(jnp.bfloat16)

    tile_H = _pick_tile_h(Ho, Wo)
    nT = Ho // tile_H
    rows = tile_H * Wo
    L = Ho * Wo

    cparams = pltpu.CompilerParams(
        dimension_semantics=("parallel", "parallel"),
        vmem_limit_bytes=_vmem_limit_bytes())

    # Whole padded sample resident in VMEM (index constant over t => one DMA
    # per sample); no wrapper-side halo duplication.
    x_spec = pl.BlockSpec((1, HP, WP, Cin), lambda n, t: (n, 0, 0, 0))
    w_spec = pl.BlockSpec((KH * KW, Cout, Cin), lambda n, t: (0, 0, 0))
    # Channel-major flat output: lane-dense (rows % 128 == 0 or full extent).
    y_spec = pl.BlockSpec((1, Cout, rows), lambda n, t: (n, 0, t))
    vec_spec = pl.BlockSpec((Cout, 1), lambda n, t: (0, 0))

    conv_kernel = _make_conv_kernel(KH, KW, tile_H, Wo, Cin, Cout, bn_act)

    if bn_act:
        # -------------------- stage 1: conv + per-tile stats ----------------
        conv_out, ssum, ssq = pl.pallas_call(
            conv_kernel,
            out_shape=(jax.ShapeDtypeStruct((N, Cout, L), jnp.float32),
                       jax.ShapeDtypeStruct((N, nT, Cout, 1), jnp.float32),
                       jax.ShapeDtypeStruct((N, nT, Cout, 1), jnp.float32)),
            grid=(N, nT),
            in_specs=[x_spec, w_spec],
            out_specs=(y_spec,
                       pl.BlockSpec((1, 1, Cout, 1), lambda n, t: (n, t, 0, 0)),
                       pl.BlockSpec((1, 1, Cout, 1), lambda n, t: (n, t, 0, 0))),
            compiler_params=cparams,
        )(xp, w_t)

        # Tiny global reduction + gamma/beta fold (train-mode biased variance).
        # NOTE: single-pass E[x^2]-E[x]^2 on f32 partial sums (clamped >= 0).
        cnt = float(N * Ho * Wo)
        s1 = jnp.sum(ssum, axis=(0, 1))[:, 0]
        s2 = jnp.sum(ssq, axis=(0, 1))[:, 0]
        mean = s1 / cnt
        var = jnp.maximum(s2 / cnt - mean * mean, 0.0)
        rstd = lax.rsqrt(var + _EPS)
        g = gamma.astype(jnp.float32)
        scale = (g * rstd).reshape(Cout, 1)
        shift = (beta.astype(jnp.float32) - mean * g * rstd).reshape(Cout, 1)

        # -------------------- stage 2: BN + LeakyReLU (f32 VPU math) --------
        out_flat = pl.pallas_call(
            _bn_leaky_kernel,
            out_shape=jax.ShapeDtypeStruct((N, Cout, L), x_nchw.dtype),
            grid=(N, nT),
            in_specs=[y_spec, vec_spec, vec_spec],
            out_specs=y_spec,
            compiler_params=cparams,
        )(conv_out, scale, shift)
    else:
        # Single stage: conv + bias written directly in the final layout.
        b = bias.astype(jnp.float32).reshape(Cout, 1)
        out_flat = pl.pallas_call(
            conv_kernel,
            out_shape=jax.ShapeDtypeStruct((N, Cout, L), x_nchw.dtype),
            grid=(N, nT),
            in_specs=[x_spec, w_spec, vec_spec],
            out_specs=y_spec,
            compiler_params=cparams,
        )(xp, w_t, b)

    return out_flat.reshape(N, Cout, Ho, Wo)                 # free reshape


def _reference(x_nchw, weight_oihw, bias, gamma, beta, padding=1, bn_act=True,
               eps=_EPS, neg_slope=_NEG_SLOPE):
    y = lax.conv_general_dilated(
        x_nchw, weight_oihw, window_strides=(1, 1),
        padding=((padding, padding), (padding, padding)),
        dimension_numbers=("NCHW", "OIHW", "NCHW"))
    if bn_act:
        mean = y.mean(axis=(0, 2, 3), keepdims=True)
        var = ((y - mean) ** 2).mean(axis=(0, 2, 3), keepdims=True)
        y = (y - mean) / jnp.sqrt(var + eps)
        y = y * gamma[None, :, None, None] + beta[None, :, None, None]
        y = jnp.where(y >= 0, y, neg_slope * y)
    else:
        y = y + bias[None, :, None, None]
    return y


if __name__ == "__main__":
    # Small deterministic instantiation: CNNBlock(4, 8, kernel_size=3, padding=1)
    N, Cin, H, W = 2, 4, 16, 16
    Cout, KH, KW = 8, 3, 3

    key = jax.random.PRNGKey(0)
    kx, kw, kb = jax.random.split(key, 3)

    x = jax.random.normal(kx, (N, Cin, H, W), dtype=jnp.float32)
    fan_in = Cin * KH * KW
    weight = jax.random.normal(kw, (Cout, Cin, KH, KW), dtype=jnp.float32) / jnp.sqrt(fan_in)
    bias = jnp.zeros((Cout,), dtype=jnp.float32)    # unused when bn_act=True
    gamma = jnp.ones((Cout,), dtype=jnp.float32)    # BatchNorm2d default weight
    beta = jnp.zeros((Cout,), dtype=jnp.float32)    # BatchNorm2d default bias

    # bn_act=True path (conv -> bn(train-mode batch stats) -> leaky).
    # Tolerance loosened because the conv matmul operands are bf16 (f32 acc).
    out = cnn_block_forward(x, weight, bias, gamma, beta, padding=1, bn_act=True)
    out = jax.block_until_ready(out)
    ref = _reference(x, weight, bias, gamma, beta, padding=1, bn_act=True)
    assert out.shape == (N, Cout, H, W), out.shape
    assert jnp.allclose(out, ref, atol=5e-2, rtol=5e-2), float(jnp.abs(out - ref).max())

    # bn_act=False path (conv with bias only)
    bias2 = jax.random.normal(kb, (Cout,), dtype=jnp.float32) * 0.1
    out2 = cnn_block_forward(x, weight, bias2, gamma, beta, padding=1, bn_act=False)
    out2 = jax.block_until_ready(out2)
    ref2 = _reference(x, weight, bias2, gamma, beta, padding=1, bn_act=False)
    assert out2.shape == (N, Cout, H, W), out2.shape
    assert jnp.allclose(out2, ref2, atol=5e-2, rtol=5e-2), float(jnp.abs(out2 - ref2).max())

    print("KERNEL_OK")
</pallas_src>

<mosaic_0001>
module attributes {stable_mosaic.version = 11 : i64} {
  func.func @kernel(%arg0: i32, %arg1: i32, %arg2: memref<1x18x18x4xbf16, #tpu.memory_space<vmem>>, %arg3: memref<9x8x4xbf16, #tpu.memory_space<vmem>>, %arg4: memref<1x8x256xf32, #tpu.memory_space<vmem>>, %arg5: memref<1x1x8x1xf32, #tpu.memory_space<vmem>>, %arg6: memref<1x1x8x1xf32, #tpu.memory_space<vmem>>) attributes {dimension_semantics = [#tpu.dimension_semantics<parallel>, #tpu.dimension_semantics<parallel>], iteration_bounds = array<i64: 2, 1>, scalar_prefetch = 0 : i64, scratch_operands = 0 : i64, tpu.core_type = #tpu.core_type<tc>, window_params = [{transform_indices = @transform_0, window_bounds = array<i64: 1, 18, 18, 4>}, {pipeline_mode = #tpu.pipeline_mode<synchronous>, transform_indices = @transform_1, window_bounds = array<i64: 9, 8, 4>}, {transform_indices = @transform_2, window_bounds = array<i64: 1, 8, 256>}, {transform_indices = @transform_3, window_bounds = array<i64: 1, 1, 8, 1>}, {transform_indices = @transform_4, window_bounds = array<i64: 1, 1, 8, 1>}]} {
    %c16_i32 = arith.constant 16 : i32
    %0 = arith.muli %arg1, %c16_i32 : i32
    %c0 = arith.constant 0 : index
    %1 = arith.index_cast %0 : i32 to index
    %c0_0 = arith.constant 0 : index
    %c0_1 = arith.constant 0 : index
    %2 = vector.load %arg2[%c0, %1, %c0_0, %c0_1] : memref<1x18x18x4xbf16, #tpu.memory_space<vmem>>, vector<1x18x18x4xbf16>
    %3 = vector.shape_cast %2 : vector<1x18x18x4xbf16> to vector<18x18x4xbf16>
    %cst = arith.constant 0.000000e+00 : f32
    %4 = vector.broadcast %cst : f32 to vector<8x256xf32>
    %5 = vector.extract_strided_slice %3 {offsets = [0, 0, 0], sizes = [16, 16, 4], strides = [1, 1, 1]} : vector<18x18x4xbf16> to vector<16x16x4xbf16>
    %6 = vector.shape_cast %5 : vector<16x16x4xbf16> to vector<256x4xbf16>
    %c0_2 = arith.constant 0 : index
    %c0_3 = arith.constant 0 : index
    %c0_4 = arith.constant 0 : index
    %7 = vector.load %arg3[%c0_2, %c0_3, %c0_4] : memref<9x8x4xbf16, #tpu.memory_space<vmem>>, vector<1x8x4xbf16>
    %8 = vector.shape_cast %7 : vector<1x8x4xbf16> to vector<8x4xbf16>
    %cst_5 = arith.constant dense<0.000000e+00> : vector<8x256xf32>
    %9 = tpu.matmul %8, %6, %cst_5 {dimension_numbers = #tpu.dot_dimension_numbers<[1], [1], [0], [0], [0, 0, 1, 0], [], []>} : vector<8x4xbf16>, vector<256x4xbf16>, vector<8x256xf32> -> vector<8x256xf32>
    %10 = arith.addf %4, %9 : vector<8x256xf32>
    %11 = vector.extract_strided_slice %3 {offsets = [0, 1, 0], sizes = [16, 16, 4], strides = [1, 1, 1]} : vector<18x18x4xbf16> to vector<16x16x4xbf16>
    %12 = vector.shape_cast %11 : vector<16x16x4xbf16> to vector<256x4xbf16>
    %c1 = arith.constant 1 : index
    %c0_6 = arith.constant 0 : index
    %c0_7 = arith.constant 0 : index
    %13 = vector.load %arg3[%c1, %c0_6, %c0_7] : memref<9x8x4xbf16, #tpu.memory_space<vmem>>, vector<1x8x4xbf16>
    %14 = vector.shape_cast %13 : vector<1x8x4xbf16> to vector<8x4xbf16>
    %cst_8 = arith.constant dense<0.000000e+00> : vector<8x256xf32>
    %15 = tpu.matmul %14, %12, %cst_8 {dimension_numbers = #tpu.dot_dimension_numbers<[1], [1], [0], [0], [0, 0, 1, 0], [], []>} : vector<8x4xbf16>, vector<256x4xbf16>, vector<8x256xf32> -> vector<8x256xf32>
    %16 = arith.addf %10, %15 : vector<8x256xf32>
    %17 = vector.extract_strided_slice %3 {offsets = [0, 2, 0], sizes = [16, 16, 4], strides = [1, 1, 1]} : vector<18x18x4xbf16> to vector<16x16x4xbf16>
    %18 = vector.shape_cast %17 : vector<16x16x4xbf16> to vector<256x4xbf16>
    %c2 = arith.constant 2 : index
    %c0_9 = arith.constant 0 : index
    %c0_10 = arith.constant 0 : index
    %19 = vector.load %arg3[%c2, %c0_9, %c0_10] : memref<9x8x4xbf16, #tpu.memory_space<vmem>>, vector<1x8x4xbf16>
    %20 = vector.shape_cast %19 : vector<1x8x4xbf16> to vector<8x4xbf16>
    %cst_11 = arith.constant dense<0.000000e+00> : vector<8x256xf32>
    %21 = tpu.matmul %20, %18, %cst_11 {dimension_numbers = #tpu.dot_dimension_numbers<[1], [1], [0], [0], [0, 0, 1, 0], [], []>} : vector<8x4xbf16>, vector<256x4xbf16>, vector<8x256xf32> -> vector<8x256xf32>
    %22 = arith.addf %16, %21 : vector<8x256xf32>
    %23 = vector.extract_strided_slice %3 {offsets = [1, 0, 0], sizes = [16, 16, 4], strides = [1, 1, 1]} : vector<18x18x4xbf16> to vector<16x16x4xbf16>
    %24 = vector.shape_cast %23 : vector<16x16x4xbf16> to vector<256x4xbf16>
    %c3 = arith.constant 3 : index
    %c0_12 = arith.constant 0 : index
    %c0_13 = arith.constant 0 : index
    %25 = vector.load %arg3[%c3, %c0_12, %c0_13] : memref<9x8x4xbf16, #tpu.memory_space<vmem>>, vector<1x8x4xbf16>
    %26 = vector.shape_cast %25 : vector<1x8x4xbf16> to vector<8x4xbf16>
    %cst_14 = arith.constant dense<0.000000e+00> : vector<8x256xf32>
    %27 = tpu.matmul %26, %24, %cst_14 {dimension_numbers = #tpu.dot_dimension_numbers<[1], [1], [0], [0], [0, 0, 1, 0], [], []>} : vector<8x4xbf16>, vector<256x4xbf16>, vector<8x256xf32> -> vector<8x256xf32>
    %28 = arith.addf %22, %27 : vector<8x256xf32>
    %29 = vector.extract_strided_slice %3 {offsets = [1, 1, 0], sizes = [16, 16, 4], strides = [1, 1, 1]} : vector<18x18x4xbf16> to vector<16x16x4xbf16>
    %30 = vector.shape_cast %29 : vector<16x16x4xbf16> to vector<256x4xbf16>
    %c4 = arith.constant 4 : index
    %c0_15 = arith.constant 0 : index
    %c0_16 = arith.constant 0 : index
    %31 = vector.load %arg3[%c4, %c0_15, %c0_16] : memref<9x8x4xbf16, #tpu.memory_space<vmem>>, vector<1x8x4xbf16>
    %32 = vector.shape_cast %31 : vector<1x8x4xbf16> to vector<8x4xbf16>
    %cst_17 = arith.constant dense<0.000000e+00> : vector<8x256xf32>
    %33 = tpu.matmul %32, %30, %cst_17 {dimension_numbers = #tpu.dot_dimension_numbers<[1], [1], [0], [0], [0, 0, 1, 0], [], []>} : vector<8x4xbf16>, vector<256x4xbf16>, vector<8x256xf32> -> vector<8x256xf32>
    %34 = arith.addf %28, %33 : vector<8x256xf32>
    %35 = vector.extract_strided_slice %3 {offsets = [1, 2, 0], sizes = [16, 16, 4], strides = [1, 1, 1]} : vector<18x18x4xbf16> to vector<16x16x4xbf16>
    %36 = vector.shape_cast %35 : vector<16x16x4xbf16> to vector<256x4xbf16>
    %c5 = arith.constant 5 : index
    %c0_18 = arith.constant 0 : index
    %c0_19 = arith.constant 0 : index
    %37 = vector.load %arg3[%c5, %c0_18, %c0_19] : memref<9x8x4xbf16, #tpu.memory_space<vmem>>, vector<1x8x4xbf16>
    %38 = vector.shape_cast %37 : vector<1x8x4xbf16> to vector<8x4xbf16>
    %cst_20 = arith.constant dense<0.000000e+00> : vector<8x256xf32>
    %39 = tpu.matmul %38, %36, %cst_20 {dimension_numbers = #tpu.dot_dimension_numbers<[1], [1], [0], [0], [0, 0, 1, 0], [], []>} : vector<8x4xbf16>, vector<256x4xbf16>, vector<8x256xf32> -> vector<8x256xf32>
    %40 = arith.addf %34, %39 : vector<8x256xf32>
    %41 = vector.extract_strided_slice %3 {offsets = [2, 0, 0], sizes = [16, 16, 4], strides = [1, 1, 1]} : vector<18x18x4xbf16> to vector<16x16x4xbf16>
    %42 = vector.shape_cast %41 : vector<16x16x4xbf16> to vector<256x4xbf16>
    %c6 = arith.constant 6 : index
    %c0_21 = arith.constant 0 : index
    %c0_22 = arith.constant 0 : index
    %43 = vector.load %arg3[%c6, %c0_21, %c0_22] : memref<9x8x4xbf16, #tpu.memory_space<vmem>>, vector<1x8x4xbf16>
    %44 = vector.shape_cast %43 : vector<1x8x4xbf16> to vector<8x4xbf16>
    %cst_23 = arith.constant dense<0.000000e+00> : vector<8x256xf32>
    %45 = tpu.matmul %44, %42, %cst_23 {dimension_numbers = #tpu.dot_dimension_numbers<[1], [1], [0], [0], [0, 0, 1, 0], [], []>} : vector<8x4xbf16>, vector<256x4xbf16>, vector<8x256xf32> -> vector<8x256xf32>
    %46 = arith.addf %40, %45 : vector<8x256xf32>
    %47 = vector.extract_strided_slice %3 {offsets = [2, 1, 0], sizes = [16, 16, 4], strides = [1, 1, 1]} : vector<18x18x4xbf16> to vector<16x16x4xbf16>
    %48 = vector.shape_cast %47 : vector<16x16x4xbf16> to vector<256x4xbf16>
    %c7 = arith.constant 7 : index
    %c0_24 = arith.constant 0 : index
    %c0_25 = arith.constant 0 : index
    %49 = vector.load %arg3[%c7, %c0_24, %c0_25] : memref<9x8x4xbf16, #tpu.memory_space<vmem>>, vector<1x8x4xbf16>
    %50 = vector.shape_cast %49 : vector<1x8x4xbf16> to vector<8x4xbf16>
    %cst_26 = arith.constant dense<0.000000e+00> : vector<8x256xf32>
    %51 = tpu.matmul %50, %48, %cst_26 {dimension_numbers = #tpu.dot_dimension_numbers<[1], [1], [0], [0], [0, 0, 1, 0], [], []>} : vector<8x4xbf16>, vector<256x4xbf16>, vector<8x256xf32> -> vector<8x256xf32>
    %52 = arith.addf %46, %51 : vector<8x256xf32>
    %53 = vector.extract_strided_slice %3 {offsets = [2, 2, 0], sizes = [16, 16, 4], strides = [1, 1, 1]} : vector<18x18x4xbf16> to vector<16x16x4xbf16>
    %54 = vector.shape_cast %53 : vector<16x16x4xbf16> to vector<256x4xbf16>
    %c8 = arith.constant 8 : index
    %c0_27 = arith.constant 0 : index
    %c0_28 = arith.constant 0 : index
    %55 = vector.load %arg3[%c8, %c0_27, %c0_28] : memref<9x8x4xbf16, #tpu.memory_space<vmem>>, vector<1x8x4xbf16>
    %56 = vector.shape_cast %55 : vector<1x8x4xbf16> to vector<8x4xbf16>
    %cst_29 = arith.constant dense<0.000000e+00> : vector<8x256xf32>
    %57 = tpu.matmul %56, %54, %cst_29 {dimension_numbers = #tpu.dot_dimension_numbers<[1], [1], [0], [0], [0, 0, 1, 0], [], []>} : vector<8x4xbf16>, vector<256x4xbf16>, vector<8x256xf32> -> vector<8x256xf32>
    %58 = arith.addf %52, %57 : vector<8x256xf32>
    %c0_30 = arith.constant 0 : index
    %c0_31 = arith.constant 0 : index
    %c0_32 = arith.constant 0 : index
    %59 = vector.load %arg4[%c0_30, %c0_31, %c0_32] : memref<1x8x256xf32, #tpu.memory_space<vmem>>, vector<1x8x256xf32>
    %60 = vector.shape_cast %59 : vector<1x8x256xf32> to vector<8x256xf32>
    %61 = vector.shape_cast %58 : vector<8x256xf32> to vector<1x8x256xf32>
    tpu.vector_store %arg4[%c0_30, %c0_31, %c0_32], %61 {strides = array<i32>} : memref<1x8x256xf32, #tpu.memory_space<vmem>>, vector<1x8x256xf32>,
    %cst_33 = arith.constant dense<0.000000e+00> : vector<8xf32>
    %62 = vector.multi_reduction <add>, %58, %cst_33 [1] : vector<8x256xf32> to vector<8xf32>
    %63 = vector.shape_cast %62 : vector<8xf32> to vector<8x1xf32>
    %c0_34 = arith.constant 0 : index
    %c0_35 = arith.constant 0 : index
    %c0_36 = arith.constant 0 : index
    %c0_37 = arith.constant 0 : index
    %64 = vector.load %arg5[%c0_34, %c0_35, %c0_36, %c0_37] : memref<1x1x8x1xf32, #tpu.memory_space<vmem>>, vector<1x1x8x1xf32>
    %65 = vector.shape_cast %64 : vector<1x1x8x1xf32> to vector<8x1xf32>
    %66 = vector.shape_cast %63 : vector<8x1xf32> to vector<1x1x8x1xf32>
    tpu.vector_store %arg5[%c0_34, %c0_35, %c0_36, %c0_37], %66 {strides = array<i32>} : memref<1x1x8x1xf32, #tpu.memory_space<vmem>>, vector<1x1x8x1xf32>,
    %67 = arith.mulf %58, %58 : vector<8x256xf32>
    %cst_38 = arith.constant dense<0.000000e+00> : vector<8xf32>
    %68 = vector.multi_reduction <add>, %67, %cst_38 [1] : vector<8x256xf32> to vector<8xf32>
    %69 = vector.shape_cast %68 : vector<8xf32> to vector<8x1xf32>
    %c0_39 = arith.constant 0 : index
    %c0_40 = arith.constant 0 : index
    %c0_41 = arith.constant 0 : index
    %c0_42 = arith.constant 0 : index
    %70 = vector.load %arg6[%c0_39, %c0_40, %c0_41, %c0_42] : memref<1x1x8x1xf32, #tpu.memory_space<vmem>>, vector<1x1x8x1xf32>
    %71 = vector.shape_cast %70 : vector<1x1x8x1xf32> to vector<8x1xf32>
    %72 = vector.shape_cast %69 : vector<8x1xf32> to vector<1x1x8x1xf32>
    tpu.vector_store %arg6[%c0_39, %c0_40, %c0_41, %c0_42], %72 {strides = array<i32>} : memref<1x1x8x1xf32, #tpu.memory_space<vmem>>, vector<1x1x8x1xf32>,
    return
  }
  func.func @transform_0(%arg0: i32, %arg1: i32) -> (i32, i32, i32, i32) {
    %c0_i32 = arith.constant 0 : i32
    %c0_i32_0 = arith.constant 0 : i32
    %c0_i32_1 = arith.constant 0 : i32
    %c0_i32_2 = arith.constant 0 : i32
    return %arg0, %c0_i32, %c0_i32_0, %c0_i32_1 : i32, i32, i32, i32
  }
  func.func @transform_1(%arg0: i32, %arg1: i32) -> (i32, i32, i32) {
    %c0_i32 = arith.constant 0 : i32
    %c0_i32_0 = arith.constant 0 : i32
    %c0_i32_1 = arith.constant 0 : i32
    %c0_i32_2 = arith.constant 0 : i32
    return %c0_i32, %c0_i32_0, %c0_i32_1 : i32, i32, i32
  }
  func.func @transform_2(%arg0: i32, %arg1: i32) -> (i32, i32, i32) {
    %c0_i32 = arith.constant 0 : i32
    %c0_i32_0 = arith.constant 0 : i32
    return %arg0, %c0_i32, %arg1 : i32, i32, i32
  }
  func.func @transform_3(%arg0: i32, %arg1: i32) -> (i32, i32, i32, i32) {
    %c0_i32 = arith.constant 0 : i32
    %c0_i32_0 = arith.constant 0 : i32
    %c0_i32_1 = arith.constant 0 : i32
    return %arg0, %arg1, %c0_i32, %c0_i32_0 : i32, i32, i32, i32
  }
  func.func @transform_4(%arg0: i32, %arg1: i32) -> (i32, i32, i32, i32) {
    %c0_i32 = arith.constant 0 : i32
    %c0_i32_0 = arith.constant 0 : i32
    %c0_i32_1 = arith.constant 0 : i32
    return %arg0, %arg1, %c0_i32, %c0_i32_0 : i32, i32, i32, i32
  }
}

module attributes {stable_mosaic.version = 11 : i64} {
  func.func @_bn_leaky_kernel(%arg0: i32, %arg1: i32, %arg2: memref<1x8x256xf32, #tpu.memory_space<vmem>>, %arg3: memref<8x1xf32, #tpu.memory_space<vmem>>, %arg4: memref<8x1xf32, #tpu.memory_space<vmem>>, %arg5: memref<1x8x256xf32, #tpu.memory_space<vmem>>) attributes {dimension_semantics = [#tpu.dimension_semantics<parallel>, #tpu.dimension_semantics<parallel>], iteration_bounds = array<i64: 2, 1>, scalar_prefetch = 0 : i64, scratch_operands = 0 : i64, tpu.core_type = #tpu.core_type<tc>, window_params = [{transform_indices = @transform_0, window_bounds = array<i64: 1, 8, 256>}, {pipeline_mode = #tpu.pipeline_mode<synchronous>, transform_indices = @transform_1, window_bounds = array<i64: 8, 1>}, {pipeline_mode = #tpu.pipeline_mode<synchronous>, transform_indices = @transform_2, window_bounds = array<i64: 8, 1>}, {transform_indices = @transform_3, window_bounds = array<i64: 1, 8, 256>}]} {
    %c0 = arith.constant 0 : index
    %c0_0 = arith.constant 0 : index
    %c0_1 = arith.constant 0 : index
    %0 = vector.load %arg2[%c0, %c0_0, %c0_1] : memref<1x8x256xf32, #tpu.memory_space<vmem>>, vector<1x8x256xf32>
    %c0_2 = arith.constant 0 : index
    %c0_3 = arith.constant 0 : index
    %1 = vector.load %arg3[%c0_2, %c0_3] : memref<8x1xf32, #tpu.memory_space<vmem>>, vector<8x1xf32>
    %2 = vector.shape_cast %1 : vector<8x1xf32> to vector<1x8x1xf32>
    %3 = vector.broadcast %2 : vector<1x8x1xf32> to vector<1x8x256xf32>
    %4 = arith.mulf %0, %3 : vector<1x8x256xf32>
    %c0_4 = arith.constant 0 : index
    %c0_5 = arith.constant 0 : index
    %5 = vector.load %arg4[%c0_4, %c0_5] : memref<8x1xf32, #tpu.memory_space<vmem>>, vector<8x1xf32>
    %6 = vector.shape_cast %5 : vector<8x1xf32> to vector<1x8x1xf32>
    %7 = vector.broadcast %6 : vector<1x8x1xf32> to vector<1x8x256xf32>
    %8 = arith.addf %4, %7 : vector<1x8x256xf32>
    %cst = arith.constant 0.000000e+00 : f32
    %9 = vector.broadcast %cst : f32 to vector<1x8x256xf32>
    %10 = arith.cmpf oge, %8, %9 : vector<1x8x256xf32>
    %cst_6 = arith.constant 1.000000e-01 : f32
    %11 = vector.broadcast %cst_6 : f32 to vector<1x8x256xf32>
    %12 = arith.mulf %11, %8 : vector<1x8x256xf32>
    %13 = arith.select %10, %8, %12 : vector<1x8x256xi1>, vector<1x8x256xf32>
    %c0_7 = arith.constant 0 : index
    %c0_8 = arith.constant 0 : index
    %c0_9 = arith.constant 0 : index
    %14 = vector.load %arg5[%c0_7, %c0_8, %c0_9] : memref<1x8x256xf32, #tpu.memory_space<vmem>>, vector<1x8x256xf32>
    tpu.vector_store %arg5[%c0_7, %c0_8, %c0_9], %13 {strides = array<i32>} : memref<1x8x256xf32, #tpu.memory_space<vmem>>, vector<1x8x256xf32>,
    return
  }
  func.func @transform_0(%arg0: i32, %arg1: i32) -> (i32, i32, i32) {
    %c0_i32 = arith.constant 0 : i32
    %c0_i32_0 = arith.constant 0 : i32
    return %arg0, %c0_i32, %arg1 : i32, i32, i32
  }
  func.func @transform_1(%arg0: i32, %arg1: i32) -> (i32, i32) {
    %c0_i32 = arith.constant 0 : i32
    %c0_i32_0 = arith.constant 0 : i32
    %c0_i32_1 = arith.constant 0 : i32
    return %c0_i32, %c0_i32_0 : i32, i32
  }
  func.func @transform_2(%arg0: i32, %arg1: i32) -> (i32, i32) {
    %c0_i32 = arith.constant 0 : i32
    %c0_i32_0 = arith.constant 0 : i32
    %c0_i32_1 = arith.constant 0 : i32
    return %c0_i32, %c0_i32_0 : i32, i32
  }
  func.func @transform_3(%arg0: i32, %arg1: i32) -> (i32, i32, i32) {
    %c0_i32 = arith.constant 0 : i32
    %c0_i32_0 = arith.constant 0 : i32
    return %arg0, %c0_i32, %arg1 : i32, i32, i32
  }
}

</mosaic_0001>

<bundles_post_ra>
// kernel: cnn_block_forward.3
= control target key start
LH: loop header
LB: loop body
LE: loop exit
PB: predicated region body
PF: predicated region fallthrough
CT: control target
= control target key end

     0   :  { %s407_s12 = smov 0   ;;  %s409_s13 = smov 0   ;;  %s446_s0 = inlined_call_operand.vmem [shape: f32[2,8,256], index: 0, kind: input, shape index: {}]   ;;  %s447_s1 = inlined_call_operand.vmem [shape: f32[8,1], index: 1, kind: input, shape index: {}]   ;;  %s448_s2 = inlined_call_operand.vmem [shape: f32[8,1], index: 2, kind: input, shape index: {}]   ;;  %s449_s3 = inlined_call_operand.vmem [shape: f32[2,8,256], index: 3, kind: output, shape index: {}]  }
   0x1   :  { %s411_s14 = smov 0  }
   0x2 LB: > { %s25_s15 = sadd.s32 1, %s380_s13  ;;  %p327_p0 = scmp.ge.s32.totalorder %s384_s14, 1  ;;  %s384_s14 = sphi %s411_s14, %s13_s14   ;;  %s380_s13 = sphi %s409_s13, %s451_s13   ;;  %s376_s12 = sphi %s407_s12, %s450_s12  }
   0x3   : > { %p27_p1 = scmp.ge.s32.totalorder %s25_s15, 2  ;;  %p158_p2 = scmp.lt.s32.totalorder %s384_s14, 3 }
   0x5   : > { %s453_s15 = smov (%p27_p1, %s25_s15), 0  ;;  %p159_p3 = pnand %p327_p0, %p158_p2 }
   0x6   : > { %v212_v0 = vld [vmem:[%s447_s1] sm:$0xff] (!%p159_p3)  ;;  %v386_v1 = vmov (!%p159_p3), 0   ;;  %p191_p4 = scmp.lt.s32.totalorder (!%p159_p3), %s376_s12, 1 }
   0x7   : > { %162 = sbr.rel (%p159_p3) target bundleno = 146 (0x92), region = 32  ;;  %361 = vset.pattern.permute.xlu0 (!%p159_p3), %v386_v1  ;;  %v220_v2 = vld [vmem:[%s448_s2] sm:$0xff] (!%p159_p3) }
   0x8   : > { %215 = vperm.xlu0 (!%p159_p3), %361, %v212_v0  }
   0xc   : > { %223 = vperm.xlu0 (!%p159_p3), %361, %v220_v2  }
   0xe   : > { %s455_s12 = smov (!%p191_p4, %s376_s12), 1 }
   0xf   : > { %s334_s20 = sshll.u32 %s455_s12, 4 }
  0x10   : > { %s198_s23 = scalar_lea.vmem %s446_s0, %s334_s20  ;;  %s208_s26 = scalar_lea.vmem %s449_s3, %s334_s20 }
  0x11   : > { %v210_v4 = vld [vmem:[%s198_s23] sm:$0xff]  ;;  %v211_v5 = vld [vmem:[%s198_s23 + $0x8] sm:$0xff] }
  0x87   : > { %v216_v3 = vpop.permute.xlu0 %215 }
  0x88   : > { %v218_v6 = vmul.f32 %v216_v3, %v210_v4  ;;  %v219_v7 = vmul.f32 %v216_v3, %v211_v5 }
  0x8b   : > { %v224_v8 = vpop.permute.xlu0 %223 }
  0x8c   : > { %v226_v9 = vadd.f32 %v224_v8, %v218_v6  ;;  %v227_v10 = vadd.f32 %v224_v8, %v219_v7 }
  0x8e   : > { %vm228_vm0 = vcmp.ge.f32.partialorder %v226_v9, 0.0  ;;  %vm229_vm1 = vcmp.ge.f32.partialorder %v227_v10, 0.0  ;;  %v230_v11 = vmul.f32 0.1, %v226_v9  ;;  %v231_v12 = vmul.f32 0.1, %v227_v10 }
  0x90   : > { %v232_v13 = vsel %vm228_vm0, %v226_v9, %v230_v11  ;;  %v233_v14 = vsel %vm229_vm1, %v227_v10, %v231_v12 }
  0x91   : > { %234 = vst [vmem:[%s208_s26] sm:$0xff] %v232_v13  ;;  %235 = vst [vmem:[%s208_s26 + $0x8] sm:$0xff] %v233_v14 }
  0x92 PF: > { %s13_s14 = sadd.s32 1, %s384_s14   ;;  %s450_s12 = smov %s380_s13 }
  0x93   : > { %p10_p5 = scmp.ge.s32.totalorder %s13_s14, 4   ;;  %s451_s13 = smov %s453_s15 }
  0x95   :  { %12 = sbr.rel (!%p10_p5) target bundleno = 2 (0x2), region = 62 }

// kernel: cnn_block_forward.2
= control target key start
LH: loop header
LB: loop body
LE: loop exit
PB: predicated region body
PF: predicated region fallthrough
CT: control target
= control target key end

     0   :  { %s2329_s15 = smov 0   ;;  %s2331_s16 = smov 0   ;;  %s3290_s0 = inlined_call_operand.vmem [shape: bf16[2,18,18,4], index: 0, kind: input, shape index: {}]   ;;  %s3291_s1 = inlined_call_operand.vmem [shape: bf16[9,8,4], index: 1, kind: input, shape index: {}]   ;;  %s3292_s2 = inlined_call_operand.vmem [shape: f32[2,8,256], index: 2, kind: output, shape index: {0}]   ;;  %s3293_s3 = inlined_call_operand.vmem [shape: f32[2,1,8,1], index: 3, kind: output, shape index: {1}]   ;;  %s3294_s4 = inlined_call_operand.vmem [shape: f32[2,1,8,1], index: 4, kind: output, shape index: {2}]  }
   0x1   :  { %s2333_s17 = smov 0  }
   0x2 LB: > { %s27_s18 = sadd.s32 1, %s2298_s16  ;;  %p1869_p0 = scmp.ge.s32.totalorder %s2302_s17, 1  ;;  %s2302_s17 = sphi %s2333_s17, %s15_s17   ;;  %s2298_s16 = sphi %s2331_s16, %s3372_s16   ;;  %s2294_s15 = sphi %s2329_s15, %s3371_s15  }
   0x3   : > { %p29_p1 = scmp.ge.s32.totalorder %s27_s18, 2  ;;  %p185_p2 = scmp.lt.s32.totalorder %s2302_s17, 3 }
   0x5   : > { %s3374_s18 = smov (%p29_p1, %s27_s18), 0  ;;  %p186_p3 = pnand %p1869_p0, %p185_p2 }
   0x7   : > { %189 = sbr.rel (%p186_p3) target bundleno = 734 (0x2de), region = 28 }
   0xe   : > { %p229_p4 = scmp.lt.s32.totalorder %s2294_s15, 1  ;;  %vm755_vm0 = vcmask 31744   ;;  %v2350_v0 = vld [vmem:[%s3291_s1 + $0x4] sm:$0xf]  ;;  %v2355_v1 = vld [vmem:[%s3291_s1 + $0x10] sm:$0xf] }
   0xf   : > { %1983 = vmatprep.mubr.msk.bf16.mxu1 %vm755_vm0, %v2350_v0  ;;  %2055 = vmatprep.mubr.msk.bf16.mxu0 %vm755_vm0, %v2355_v1  ;;  %vm318_vm1 = vsmask.f32 3328  ;;  %vm319_vm2 = vsmask.f32 7440  ;;  %vm1036_vm4 = vcmask 1042432   ;;  %vm1037_vm5 = vcmask 1046532  }
  0x10   : > { %s3376_s15 = smov (!%p229_p4, %s2294_s15), 1  ;;  %vm2402_vm3 = vmor %vm318_vm1, %vm319_vm2  ;;  %v1961_v27 = vld [vmem:[%s3291_s1 + $0x20] sm:$0xf]  ;;  %vm1692_vm7 = vcmask 7168  }
  0x11   : > { %s2231_s23 = smul.u32 216, %s3376_s15  ;;  %vm2745_vm6 = vmor %vm1036_vm4, %vm1037_vm5  ;;  %s1966_s19 = sshll.u32 %s3376_s15, 4 }
  0x12   : > { %s242_s22 = scalar_lea.vmem %s3292_s2, %s1966_s19 }
  0x13   : > { %s2367_s26 = scalar_lea.vmem %s3290_s0, %s2231_s23  ;;  %s1873_s23 = sshll.u32 %s3376_s15, 3 }
  0x14   : > { %v2370_v2 = vld [vmem:[%s2367_s26 + $0x60] sm:$0xf]  ;;  %v2373_v3 = vld [vmem:[%s2367_s26 + $0x64] sm:$0xf]  ;;  %v289_v4 = vld [vmem:[%s2367_s26 + $0x68] sm:$0x1]  ;;  %s257_s29 = scalar_lea.vmem %s3294_s4, %s1873_s23 }
  0x15   : > { %v514_v5 = vshrl.u32 %v2370_v2, 16  ;;  %v517_v6 = vshll.u32 %v2370_v2, 16  ;;  %v523_v7 = vshll.u32 %v2373_v3, 16  ;;  %v527_v8 = vshrl.u32 %v2373_v3, 16  ;;  %v2381_v9 = vld [vmem:[%s2367_s26 + $0x6c] sm:$0xf] }
  0x16   : > { %v533_v10 = vshll.u32 %v289_v4, 16  ;;  %v2384_v11 = vld [vmem:[%s2367_s26 + $0x70] sm:$0xf]  ;;  %v2387_v12 = vld [vmem:[%s2367_s26 + $0x74] sm:$0x1]  ;;  %v538_v18 = vshrl.u32 %v2381_v9, 16 }
  0x17   : > { %v516_v13 = vrot.slane %v514_v5, 4  ;;  %v519_v14 = vrot.slane %v517_v6, 5  ;;  %v525_v15 = vrot.slane %v523_v7, 5  ;;  %v529_v16 = vrot.slane %v527_v8, 4  ;;  %v2395_v25 = vld [vmem:[%s2367_s26] sm:$0xf] }
  0x18   : > { %v535_v17 = vrot.slane %v533_v10, 5  ;;  %v541_v19 = vshll.u32 %v2381_v9, 16  ;;  %v547_v20 = vshll.u32 %v2384_v11, 16  ;;  %v551_v23 = vshrl.u32 %v2384_v11, 16  ;;  %v2398_v26 = vld [vmem:[%s2367_s26 + $0x4] sm:$0xf] }
  0x19   : > { %v520_v21 = vor.u32 %v519_v14, %v516_v13  ;;  %v530_v22 = vor.u32 %v529_v16, %v525_v15  ;;  %v557_v24 = vshll.u32 %v2387_v12, 16  ;;  %v540_v28 = vrot.slane %v538_v18, 4  ;;  %v265_v36 = vld [vmem:[%s2367_s26 + $0x8] sm:$0x1]  ;;  %v2416_v44 = vld [vmem:[%s2367_s26 + $0xc] sm:$0xf] }
  0x1a   : > { %v543_v29 = vrot.slane %v541_v19, 5  ;;  %v549_v30 = vrot.slane %v547_v20, 5  ;;  %v553_v33 = vrot.slane %v551_v23, 4  ;;  %v322_v37 = vshrl.u32 %v2395_v25, 16  ;;  %v2421_v53 = vld [vmem:[%s2367_s26 + $0x10] sm:$0xf] }
  0x1b   : > { %v521_v31 = vrot.slane %v520_v21, 4  ;;  %v531_v32 = vrot.slane %v530_v22, 4  ;;  %v559_v34 = vrot.slane %v557_v24, 5  ;;  %v325_v38 = vshll.u32 %v2395_v25, 16  ;;  %v2428_v56 = vld [vmem:[%s2367_s26 + $0x14] sm:$0x1] }
  0x1c   : > { %v544_v35 = vor.u32 %v543_v29, %v540_v28  ;;  %v331_v39 = vshll.u32 %v2398_v26, 16  ;;  %v554_v42 = vor.u32 %v553_v33, %v549_v30  ;;  %v335_v43 = vshrl.u32 %v2398_v26, 16  ;;  %v2435_v62 = vld [vmem:[%s2367_s26 + $0x78] sm:$0xf]  ;;  %v2443_v14 = vld [vmem:[%s2367_s26 + $0x7c] sm:$0xf] }
  0x1d   : > { %v526_v40 = vsel %vm2402_vm3, %v521_v31, %v525_v15  ;;  %v536_v41 = vsel %vm2402_vm3, %v531_v32, %v535_v17  ;;  %v324_v47 = vrot.slane %v322_v37, 4  ;;  %v327_v48 = vrot.slane %v325_v38, 5  ;;  %v2450_v17 = vld [vmem:[%s2367_s26 + $0x80] sm:$0x1]  ;;  %v2456_v23 = vld [vmem:[%s2367_s26 + $0x18] sm:$0xf] }
  0x1e   : > { %v2418_v45 = vcombine.low %v526_v40, %v536_v41  ;;  %v545_v46 = vrot.slane %v544_v35, 4  ;;  %v555_v49 = vrot.slane %v554_v42, 4  ;;  %v333_v50 = vrot.slane %v331_v39, 5  ;;  %v2463_v35 = vld [vmem:[%s2367_s26 + $0x1c] sm:$0xf] }
  0x1f   : > { %v337_v51 = vrot.slane %v335_v43, 4  ;;  %v341_v52 = vshll.u32 %v265_v36, 16  ;;  %v328_v55 = vor.u32 %v327_v48, %v324_v47  ;;  %v346_v57 = vshrl.u32 %v2416_v44, 16  ;;  %v2467_v39 = vld [vmem:[%s2367_s26 + $0x20] sm:$0x1] }
  0x20   : > { %2159 = vmatprep.subr.msk.bf16.mxu1 %vm755_vm0, %v2418_v45  ;;  %v550_v54 = vsel %vm2402_vm3, %v545_v46, %v549_v30  ;;  %v560_v58 = vsel %vm2402_vm3, %v555_v49, %v559_v34  ;;  %v349_v61 = vshll.u32 %v2416_v44, 16  ;;  %v355_v6 = vshll.u32 %v2421_v53, 16 }
  0x21   : > { %v338_v59 = vor.u32 %v337_v51, %v333_v50  ;;  %v343_v60 = vrot.slane %v341_v52, 5  ;;  %v2437_v63 = vcombine.low %v550_v54, %v560_v58  ;;  %v329_v4 = vrot.slane %v328_v55, 4  ;;  %v2477_v51 = vld [vmem:[%s2367_s26 + $0x84] sm:$0xf] }
  0x22   : > { %v348_v5 = vrot.slane %v346_v57, 4  ;;  %v351_v8 = vrot.slane %v349_v61, 5  ;;  %v359_v10 = vshrl.u32 %v2421_v53, 16  ;;  %v365_v13 = vshll.u32 %v2428_v56, 16 }
  0x23   : > { %3325 = vst [vmem:[#allocation2_spill] sm:$0xff] %v2437_v63  ;;  %v339_v7 = vrot.slane %v338_v59, 4  ;;  %2191 = vmatprep.subr.msk.bf16.mxu0 %vm755_vm0, %v2437_v63  ;;  %v334_v15 = vsel %vm2402_vm3, %v329_v4, %v333_v50  ;;  %v357_v16 = vrot.slane %v355_v6, 5  ;;  %v562_v18 = vshrl.u32 %v2435_v62, 16  ;;  %v2484_v4 = vld [vmem:[%s2367_s26 + $0x88] sm:$0xf] }
  0x24   : > { %v352_v20 = vor.u32 %v351_v8, %v348_v5  ;;  %v361_v21 = vrot.slane %v359_v10, 4  ;;  %v367_v22 = vrot.slane %v365_v13, 5  ;;  %v565_v29 = vshll.u32 %v2435_v62, 16 }
  0x25   : > { %v344_v19 = vsel %vm2402_vm3, %v339_v7, %v343_v60  ;;  %v564_v28 = vrot.slane %v562_v18, 4  ;;  %v571_v30 = vshll.u32 %v2443_v14, 16  ;;  %v575_v33 = vshrl.u32 %v2443_v14, 16 }
  0x26   : > { %v1876_v24 = vcombine.low %v334_v15, %v344_v19  ;;  %v353_v31 = vrot.slane %v352_v20, 4  ;;  %v362_v32 = vor.u32 %v361_v21, %v357_v16  ;;  %v581_v34 = vshll.u32 %v2450_v17, 16  ;;  %v2495_v19 = vld [vmem:[%s2367_s26 + $0x24] sm:$0xf] }
  0x27   : > { %v567_v37 = vrot.slane %v565_v29, 5  ;;  %v573_v38 = vrot.slane %v571_v30, 5  ;;  %v370_v40 = vshrl.u32 %v2456_v23, 16  ;;  %v577_v43 = vrot.slane %v575_v33, 4 }
  0x28   : > { %v760_v36 = vsel %vm755_vm0, %v1876_v24, 0  ;;  %v358_v41 = vsel %vm2402_vm3, %v353_v31, %v357_v16  ;;  %v363_v42 = vrot.slane %v362_v32, 4  ;;  %v583_v46 = vrot.slane %v581_v34, 5  ;;  %v2491_v16 = vld [vmem:[%s2367_s26 + $0x8c] sm:$0x1] }
  0x29   : > { %1968 = vmatpush3.bf16.xpose.msra.mxu1 %v760_v36  ;;  %v568_v47 = vor.u32 %v567_v37, %v564_v28  ;;  %v372_v48 = vrot.slane %v370_v40, 4  ;;  %v373_v49 = vshll.u32 %v2456_v23, 16  ;;  %v379_v50 = vshll.u32 %v2463_v35, 16  ;;  %v2504_v32 = vld [vmem:[%s2367_s26 + $0x28] sm:$0xf] }
  0x2a   : > { %2160 = vmatprep.subr.msk.bf16.mxu1 %vm755_vm0, %v2437_v63  ;;  %v368_v52 = vsel %vm2402_vm3, %v363_v42, %v367_v22  ;;  %v578_v54 = vor.u32 %v577_v43, %v573_v38  ;;  %v383_v55 = vshrl.u32 %v2463_v35, 16  ;;  %v389_v57 = vshll.u32 %v2467_v39, 16  ;;  %v2515_v42 = vld [vmem:[%s2367_s26 + $0x2c] sm:$0x1] }
  0x2b   : > { %v1877_v58 = vcombine.low %v358_v41, %v368_v52  ;;  %v569_v59 = vrot.slane %v568_v47, 4  ;;  %v375_v60 = vrot.slane %v373_v49, 5  ;;  %v381_v61 = vrot.slane %v379_v50, 5 }
  0x2c   : > { %v579_v5 = vrot.slane %v578_v54, 4  ;;  %v385_v6 = vrot.slane %v383_v55, 4  ;;  %v391_v7 = vrot.slane %v389_v57, 5  ;;  %v586_v8 = vshrl.u32 %v2477_v51, 16 }
  0x2d   : > { %v763_v10 = vsel %vm755_vm0, %v1877_v58, 0  ;;  %v574_v13 = vsel %vm2402_vm3, %v569_v59, %v573_v38  ;;  %v376_v15 = vor.u32 %v375_v60, %v372_v48  ;;  %v589_v18 = vshll.u32 %v2477_v51, 16 }
  0x2e   : > { %2040 = vmatpush3.bf16.xpose.msra.mxu0 %v763_v10  ;;  %v584_v20 = vsel %vm2402_vm3, %v579_v5, %v583_v46  ;;  %v386_v21 = vor.u32 %v385_v6, %v381_v61  ;;  %v588_v22 = vrot.slane %v586_v8, 4  ;;  %v595_v24 = vshll.u32 %v2484_v4, 16  ;;  %v2519_v46 = vld [vmem:[%s2367_s26 + $0x90] sm:$0xf] }
  0x2f   : > { %v2500_v28 = vcombine.low %v574_v13, %v584_v20  ;;  %v377_v29 = vrot.slane %v376_v15, 4  ;;  %v591_v30 = vrot.slane %v589_v18, 5  ;;  %v599_v31 = vshrl.u32 %v2484_v4, 16  ;;  %v2536_v13 = vld [vmem:[%s2367_s26 + $0x98] sm:$0x1] }
  0x30   : > { %v387_v33 = vrot.slane %v386_v21, 4  ;;  %v597_v34 = vrot.slane %v595_v24, 5  ;;  %v605_v36 = vshll.u32 %v2491_v16, 16  ;;  %v394_v37 = vshrl.u32 %v2495_v19, 16 }
  0x31   : > { %3326 = vst [vmem:[#allocation3_spill] sm:$0xff] %v2500_v28  ;;  %1970 = vmatpush3.bf16.xpose.msra.mxu1 %v763_v10  ;;  %2192 = vmatprep.subr.msk.bf16.mxu0 %vm755_vm0, %v2500_v28  ;;  %v382_v38 = vsel %vm2402_vm3, %v377_v29, %v381_v61  ;;  %v592_v40 = vor.u32 %v591_v30, %v588_v22  ;;  %v601_v41 = vrot.slane %v599_v31, 4  ;;  %v397_v43 = vshll.u32 %v2495_v19, 16  ;;  %v2527_v61 = vld [vmem:[%s2367_s26 + $0x94] sm:$0xf] }
  0x32   : > { %2161 = vmatprep.subr.msk.bf16.mxu1 %vm755_vm0, %v2500_v28  ;;  %v392_v47 = vsel %vm2402_vm3, %v387_v33, %v391_v7  ;;  %v607_v48 = vrot.slane %v605_v36, 5  ;;  %v396_v49 = vrot.slane %v394_v37, 4  ;;  %v403_v50 = vshll.u32 %v2504_v32, 16  ;;  %v2541_v22 = vld [vmem:[%s2367_s26 + $0x30] sm:$0xf] }
  0x33   : > { %v1878_v52 = vcombine.low %v382_v38, %v392_v47  ;;  %v593_v54 = vrot.slane %v592_v40, 4  ;;  %v602_v55 = vor.u32 %v601_v41, %v597_v34  ;;  %v399_v57 = vrot.slane %v397_v43, 5  ;;  %v2552_v38 = vld [vmem:[%s2367_s26 + $0x34] sm:$0xf]  ;;  %v2557_v47 = vld [vmem:[%s2367_s26 + $0x38] sm:$0x1] }
  0x34   : > { %v405_v58 = vrot.slane %v403_v50, 5  ;;  %v407_v59 = vshrl.u32 %v2504_v32, 16  ;;  %v413_v60 = vshll.u32 %v2515_v42, 16  ;;  %v610_v5 = vshrl.u32 %v2519_v46, 16 }
  0x35   : > { %v2531_v6 = vsel %vm755_vm0, %v1878_v52, 0  ;;  %v598_v7 = vsel %vm2402_vm3, %v593_v54, %v597_v34  ;;  %v603_v8 = vrot.slane %v602_v55, 4  ;;  %v400_v10 = vor.u32 %v399_v57, %v396_v49 }
  0x36   : > { %3327 = vst [vmem:[#allocation4_spill] sm:$0xff] %v2531_v6  ;;  %2042 = vmatpush3.bf16.xpose.msra.mxu0 %v2531_v6  ;;  %v409_v15 = vrot.slane %v407_v59, 4  ;;  %v415_v18 = vrot.slane %v413_v60, 5  ;;  %v612_v20 = vrot.slane %v610_v5, 4  ;;  %v613_v21 = vshll.u32 %v2519_v46, 16 }
  0x37   : > { %v608_v24 = vsel %vm2402_vm3, %v603_v8, %v607_v48  ;;  %v401_v29 = vrot.slane %v400_v10, 4  ;;  %v619_v30 = vshll.u32 %v2527_v61, 16  ;;  %v623_v31 = vshrl.u32 %v2527_v61, 16  ;;  %v2568_v60 = vld [vmem:[%s2367_s26 + $0x9c] sm:$0xf] }
  0x38   : > { %v2547_v33 = vcombine.low %v598_v7, %v608_v24  ;;  %v410_v34 = vor.u32 %v409_v15, %v405_v58  ;;  %v615_v36 = vrot.slane %v613_v21, 5  ;;  %v629_v37 = vshll.u32 %v2536_v13, 16 }
  0x39   : > { %1972 = vmatpush3.bf16.xpose.msra.mxu1 %v2531_v6  ;;  %v406_v40 = vsel %vm2402_vm3, %v401_v29, %v405_v58  ;;  %v621_v41 = vrot.slane %v619_v30, 5  ;;  %v625_v43 = vrot.slane %v623_v31, 4  ;;  %v418_v48 = vshrl.u32 %v2541_v22, 16  ;;  %v2574_v29 = vld [vmem:[%s2367_s26 + $0xa0] sm:$0xf] }
  0x3a   : > { %3328 = vst [vmem:[#allocation5_spill] sm:$0xff] %v2547_v33  ;;  %2193 = vmatprep.subr.msk.bf16.mxu0 %vm755_vm0, %v2547_v33  ;;  %v411_v49 = vrot.slane %v410_v34, 4  ;;  %2162 = vmatprep.subr.msk.bf16.mxu1 %vm755_vm0, %v2547_v33  ;;  %v616_v50 = vor.u32 %v615_v36, %v612_v20  ;;  %v631_v52 = vrot.slane %v629_v37, 5  ;;  %v421_v54 = vshll.u32 %v2541_v22, 16  ;;  %v2579_v36 = vld [vmem:[%s2367_s26 + $0xa4] sm:$0x1] }
  0x3b   : > { %v626_v55 = vor.u32 %v625_v43, %v621_v41  ;;  %v420_v57 = vrot.slane %v418_v48, 4  ;;  %v427_v58 = vshll.u32 %v2552_v38, 16  ;;  %v431_v59 = vshrl.u32 %v2552_v38, 16  ;;  %v2621_v33 = vld [vmem:[%s2367_s26 + $0xac] sm:$0xf] }
  0x3c   : > { %v416_v5 = vsel %vm2402_vm3, %v411_v49, %v415_v18  ;;  %v617_v7 = vrot.slane %v616_v50, 4  ;;  %v423_v8 = vrot.slane %v421_v54, 5  ;;  %v437_v10 = vshll.u32 %v2557_v47, 16  ;;  %v2589_v49 = vld [vmem:[%s2367_s26 + $0x3c] sm:$0xf]  ;;  %3333 = vst [vmem:[#allocation10_spill] sm:$0xff] %v2621_v33 }
  0x3d   : > { %v1879_v15 = vcombine.low %v406_v40, %v416_v5  ;;  %v627_v20 = vrot.slane %v626_v55, 4  ;;  %v429_v21 = vrot.slane %v427_v58, 5  ;;  %v433_v24 = vrot.slane %v431_v59, 4  ;;  %v2599_v5 = vld [vmem:[%s2367_s26 + $0x40] sm:$0xf] }
  0x3e   : > { %v622_v30 = vsel %vm2402_vm3, %v617_v7, %v621_v41  ;;  %v424_v31 = vor.u32 %v423_v8, %v420_v57  ;;  %v439_v34 = vrot.slane %v437_v10, 5  ;;  %v634_v18 = vshrl.u32 %v2568_v60, 16  ;;  %v2608_v10 = vld [vmem:[%s2367_s26 + $0x44] sm:$0x1] }
  0x3f   : > { %v2583_v37 = vsel %vm755_vm0, %v1879_v15, 0  ;;  %v632_v40 = vsel %vm2402_vm3, %v627_v20, %v631_v52  ;;  %v434_v43 = vor.u32 %v433_v24, %v429_v21  ;;  %v637_v48 = vshll.u32 %v2568_v60, 16  ;;  %3331 = vst [vmem:[#allocation8_spill] sm:$0xff] %v2608_v10 }
  0x40   : > { %3329 = vst [vmem:[#allocation6_spill] sm:$0xff] %v2583_v37  ;;  %2044 = vmatpush3.bf16.xpose.msra.mxu0 %v2583_v37  ;;  %v2592_v41 = vcombine.low %v622_v30, %v632_v40  ;;  %v425_v50 = vrot.slane %v424_v31, 4  ;;  %v636_v54 = vrot.slane %v634_v18, 4  ;;  %v643_v55 = vshll.u32 %v2574_v29, 16  ;;  %v2615_v40 = vld [vmem:[%s2367_s26 + $0xa8] sm:$0xf] }
  0x41   : > { %1974 = vmatpush3.bf16.xpose.msra.mxu1 %v2583_v37  ;;  %v435_v57 = vrot.slane %v434_v43, 4  ;;  %v639_v58 = vrot.slane %v637_v48, 5  ;;  %v647_v52 = vshrl.u32 %v2574_v29, 16  ;;  %v653_v59 = vshll.u32 %v2579_v36, 16  ;;  %3332 = vst [vmem:[#allocation9_spill] sm:$0xff] %v2615_v40 }
  0x42   : > { %3330 = vst [vmem:[#allocation7_spill] sm:$0xff] %v2592_v41  ;;  %2194 = vmatprep.subr.msk.bf16.mxu0 %vm755_vm0, %v2592_v41  ;;  %v430_v7 = vsel %vm2402_vm3, %v425_v50, %v429_v21  ;;  %2163 = vmatprep.subr.msk.bf16.mxu1 %vm755_vm0, %v2592_v41  ;;  %v645_v8 = vrot.slane %v643_v55, 5  ;;  %v442_v15 = vshrl.u32 %v2589_v49, 16  ;;  %v445_v20 = vshll.u32 %v2589_v49, 16 }
  0x43   : > { %v440_v24 = vsel %vm2402_vm3, %v435_v57, %v439_v34  ;;  %v640_v30 = vor.u32 %v639_v58, %v636_v54  ;;  %v649_v31 = vrot.slane %v647_v52, 4  ;;  %v655_v18 = vrot.slane %v653_v59, 5  ;;  %v2627_v58 = vld [vmem:[%s2367_s26 + $0xb0] sm:$0x1] }
  0x44   : > { %v1880_v21 = vcombine.low %v430_v7, %v440_v24  ;;  %v444_v43 = vrot.slane %v442_v15, 4  ;;  %v447_v48 = vrot.slane %v445_v20, 5  ;;  %v451_v50 = vshll.u32 %v2599_v5, 16  ;;  %3335 = vst [vmem:[#allocation12_spill] sm:$0xff] %v2627_v58 }
  0x45   : > { %v641_v55 = vrot.slane %v640_v30, 4  ;;  %v650_v63 = vor.u32 %v649_v31, %v645_v8  ;;  %v455_v41 = vshrl.u32 %v2599_v5, 16  ;;  %v461_v37 = vshll.u32 %v2608_v10, 16 }
  0x46   : > { %v2624_v34 = vsel %vm755_vm0, %v1880_v21, 0  ;;  %v448_v54 = vor.u32 %v447_v48, %v444_v43  ;;  %v453_v57 = vrot.slane %v451_v50, 5  ;;  %v658_v52 = vshrl.u32 %v2615_v40, 16  ;;  %v2637_v43 = vld [vmem:[%s2367_s26 + $0x48] sm:$0xf] }
  0x47   : > { %3334 = vst [vmem:[#allocation11_spill] sm:$0xff] %v2624_v34  ;;  %v646_v59 = vsel %vm2402_vm3, %v641_v55, %v645_v8  ;;  %v651_v7 = vrot.slane %v650_v63, 4  ;;  %v457_v15 = vrot.slane %v455_v41, 4  ;;  %v463_v20 = vrot.slane %v461_v37, 5  ;;  %3336 = vst [vmem:[#allocation13_spill] sm:$0xff] %v2637_v43 }
  0x48   : > { %2046 = vmatpush3.bf16.xpose.msra.mxu0 %v2624_v34  ;;  %v449_v24 = vrot.slane %v448_v54, 4  ;;  %v660_v30 = vrot.slane %v658_v52, 4  ;;  %v661_v31 = vshll.u32 %v2615_v40, 16  ;;  %v667_v21 = vshll.u32 %v2621_v33, 16  ;;  %v2644_v41 = vld [vmem:[%s2367_s26 + $0x4c] sm:$0xf] }
  0x49   : > { %1976 = vmatpush3.bf16.xpose.msra.mxu1 %v2624_v34  ;;  %v656_v48 = vsel %vm2402_vm3, %v651_v7, %v655_v18  ;;  %v458_v8 = vor.u32 %v457_v15, %v453_v57  ;;  %v671_v63 = vshrl.u32 %v2621_v33, 16  ;;  %v677_v37 = vshll.u32 %v2627_v58, 16  ;;  %3337 = vst [vmem:[#allocation14_spill] sm:$0xff] %v2644_v41  ;;  %v2651_v34 = vld [vmem:[%s2367_s26 + $0x50] sm:$0x1] }
  0x4a   : > { %v2646_v50 = vcombine.low %v646_v59, %v656_v48  ;;  %v454_v55 = vsel %vm2402_vm3, %v449_v24, %v453_v57  ;;  %v663_v54 = vrot.slane %v661_v31, 5  ;;  %v669_v52 = vrot.slane %v667_v21, 5  ;;  %v2662_v31 = vld [vmem:[%s2367_s26 + $0xb4] sm:$0xf] }
  0x4b   : > { %v459_v6 = vrot.slane %v458_v8, 4  ;;  %v673_v28 = vrot.slane %v671_v63, 4  ;;  %v679_v18 = vrot.slane %v677_v37, 5  ;;  %v466_v7 = vshrl.u32 %v2637_v43, 16 }
  0x4c   : > { %3338 = vst [vmem:[#allocation15_spill] sm:$0xff] %v2646_v50  ;;  %2195 = vmatprep.subr.msk.bf16.mxu0 %vm755_vm0, %v2646_v50  ;;  %2164 = vmatprep.subr.msk.bf16.mxu1 %vm755_vm0, %v2646_v50  ;;  %v664_v59 = vor.u32 %v663_v54, %v660_v30  ;;  %v469_v15 = vshll.u32 %v2637_v43, 16  ;;  %v475_v57 = vshll.u32 %v2644_v41, 16  ;;  %v479_v24 = vshrl.u32 %v2644_v41, 16  ;;  %v2668_v43 = vld [vmem:[%s2367_s26 + $0xb8] sm:$0xf] }
  0x4d   : > { %v464_v21 = vsel %vm2402_vm3, %v459_v6, %v463_v20  ;;  %v674_v48 = vor.u32 %v673_v28, %v669_v52  ;;  %v468_v8 = vrot.slane %v466_v7, 4  ;;  %v485_v63 = vshll.u32 %v2651_v34, 16  ;;  %3339 = vst [vmem:[#allocation16_spill] sm:$0xff] %v2668_v43  ;;  %v2677_v20 = vld [vmem:[%s2367_s26 + $0xbc] sm:$0x1] }
  0x4e   : > { %v1881_v37 = vcombine.low %v454_v55, %v464_v21  ;;  %v665_v50 = vrot.slane %v664_v59, 4  ;;  %v471_v30 = vrot.slane %v469_v15, 5  ;;  %v477_v54 = vrot.slane %v475_v57, 5  ;;  %3341 = vst [vmem:[#allocation18_spill] sm:$0xff] %v2677_v20  ;;  %v2681_v7 = vld [vmem:[%s2367_s26 + $0x54] sm:$0xf] }
  0x4f   : > { %v675_v58 = vrot.slane %v674_v48, 4  ;;  %v481_v33 = vrot.slane %v479_v24, 4  ;;  %v487_v41 = vrot.slane %v485_v63, 5  ;;  %v682_v40 = vshrl.u32 %v2662_v31, 16  ;;  %3342 = vst [vmem:[#allocation19_spill] sm:$0xff] %v2681_v7 }
  0x50   : > { %v2672_v10 = vsel %vm755_vm0, %v1881_v37, 0  ;;  %v670_v28 = vsel %vm2402_vm3, %v665_v50, %v669_v52  ;;  %v472_v6 = vor.u32 %v471_v30, %v468_v8  ;;  %v685_v55 = vshll.u32 %v2662_v31, 16  ;;  %v2692_v8 = vld [vmem:[%s2367_s26 + $0x58] sm:$0xf] }
  0x51   : > { %3340 = vst [vmem:[#allocation17_spill] sm:$0xff] %v2672_v10  ;;  %2048 = vmatpush3.bf16.xpose.msra.mxu0 %v2672_v10  ;;  %v680_v59 = vsel %vm2402_vm3, %v675_v58, %v679_v18  ;;  %1978 = vmatpush3.bf16.xpose.msra.mxu1 %v2672_v10  ;;  %v482_v15 = vor.u32 %v481_v33, %v477_v54  ;;  %v684_v57 = vrot.slane %v682_v40, 4  ;;  %v691_v24 = vshll.u32 %v2668_v43, 16 }
  0x52   : > { %v2688_v21 = vcombine.low %v670_v28, %v680_v59  ;;  %v473_v50 = vrot.slane %v472_v6, 4  ;;  %v687_v52 = vrot.slane %v685_v55, 5  ;;  %v695_v48 = vshrl.u32 %v2668_v43, 16  ;;  %v2703_v28 = vld [vmem:[%s2367_s26 + $0x5c] sm:$0x1] }
  0x53   : > { %v483_v63 = vrot.slane %v482_v15, 4  ;;  %v693_v37 = vrot.slane %v691_v24, 5  ;;  %v701_v58 = vshll.u32 %v2677_v20, 16  ;;  %v490_v18 = vshrl.u32 %v2681_v7, 16  ;;  %3344 = vst [vmem:[#allocation21_spill] sm:$0xff] %v2703_v28 }
  0x54   : > { %3343 = vst [vmem:[#allocation20_spill] sm:$0xff] %v2688_v21  ;;  %2196 = vmatprep.subr.msk.bf16.mxu0 %vm755_vm0, %v2688_v21  ;;  %v478_v33 = vsel %vm2402_vm3, %v473_v50, %v477_v54  ;;  %2165 = vmatprep.subr.msk.bf16.mxu1 %vm755_vm0, %v2688_v21  ;;  %v688_v40 = vor.u32 %v687_v52, %v684_v57  ;;  %v697_v30 = vrot.slane %v695_v48, 4  ;;  %v493_v6 = vshll.u32 %v2681_v7, 16  ;;  %v2707_v55 = vld [vmem:[%s2367_s26 + $0xc0] sm:$0xf] }
  0x55   : > { %v488_v59 = vsel %vm2402_vm3, %v483_v63, %v487_v41  ;;  %v703_v15 = vrot.slane %v701_v58, 5  ;;  %v492_v24 = vrot.slane %v490_v18, 4  ;;  %v499_v54 = vshll.u32 %v2692_v8, 16  ;;  %v2715_v7 = vld [vmem:[%s2367_s26 + $0xc4] sm:$0xf] }
  0x56   : > { %v1882_v50 = vcombine.low %v478_v33, %v488_v59  ;;  %v689_v10 = vrot.slane %v688_v40, 4  ;;  %v698_v21 = vor.u32 %v697_v30, %v693_v37  ;;  %v495_v57 = vrot.slane %v493_v6, 5  ;;  %v2724_v33 = vld [vmem:[%s2367_s26 + $0xc8] sm:$0x1] }
  0x57   : > { %v501_v52 = vrot.slane %v499_v54, 5  ;;  %v503_v48 = vshrl.u32 %v2692_v8, 16  ;;  %v509_v20 = vshll.u32 %v2703_v28, 16  ;;  %v1352_v43 = vshrl.u32 %v2707_v55, 16 }
  0x58   : > { %v2719_v41 = vsel %vm755_vm0, %v1882_v50, 0  ;;  %v694_v63 = vsel %vm2402_vm3, %v689_v10, %v693_v37  ;;  %v699_v58 = vrot.slane %v698_v21, 4  ;;  %v496_v18 = vor.u32 %v495_v57, %v492_v24 }
  0x59   : > { %3345 = vst [vmem:[#allocation22_spill] sm:$0xff] %v2719_v41  ;;  %2050 = vmatpush3.bf16.xpose.msra.mxu0 %v2719_v41  ;;  %1980 = vmatpush3.bf16.xpose.msra.mxu1 %v2719_v41  ;;  %v505_v40 = vrot.slane %v503_v48, 4  ;;  %v511_v30 = vrot.slane %v509_v20, 5  ;;  %v1354_v6 = vrot.slane %v1352_v43, 4  ;;  %v1355_v59 = vshll.u32 %v2707_v55, 16 }
  0x5a   : > { %v704_v54 = vsel %vm2402_vm3, %v699_v58, %v703_v15  ;;  %v497_v50 = vrot.slane %v496_v18, 4  ;;  %v1361_v28 = vshll.u32 %v2715_v7, 16  ;;  %v1365_v10 = vshrl.u32 %v2715_v7, 16 }
  0x5b   : > { %v2733_v21 = vcombine.low %v694_v63, %v704_v54  ;;  %v506_v37 = vor.u32 %v505_v40, %v501_v52  ;;  %v1357_v24 = vrot.slane %v1355_v59, 5  ;;  %v1371_v57 = vshll.u32 %v2724_v33, 16 }
  0x5c   : > { %v1107_v48 = vrot.slane %v2387_v12, 5  ;;  %v1363_v20 = vrot.slane %v1361_v28, 5  ;;  %v1367_v43 = vrot.slane %v1365_v10, 4  ;;  %v502_v15 = vsel %vm2402_vm3, %v497_v50, %v501_v52 }
  0x5d   : > { %3346 = vst [vmem:[#allocation23_spill] sm:$0xff] %v2733_v21  ;;  %2197 = vmatprep.subr.msk.bf16.mxu0 %vm755_vm0, %v2733_v21  ;;  %v507_v58 = vrot.slane %v506_v37, 4  ;;  %2166 = vmatprep.subr.msk.bf16.mxu1 %vm755_vm0, %v2733_v21  ;;  %v1358_v63 = vor.u32 %v1357_v24, %v1354_v6  ;;  %v1373_v18 = vrot.slane %v1371_v57, 5  ;;  %v1919_v12 = vrot.slane %v2381_v9, 9 }
  0x5e   : > { %v1368_v40 = vor.u32 %v1367_v43, %v1363_v20  ;;  %v1104_v28 = vrot.slane %v2384_v11, 5  ;;  %v1911_v54 = vrot.slane %v2416_v44, 9  ;;  %v1051_v52 = vrot.slane %v2428_v56, 5 }
  0x5f   : > { %v512_v50 = vsel %vm2402_vm3, %v507_v58, %v511_v30  ;;  %v1359_v6 = vrot.slane %v1358_v63, 4  ;;  %v1048_v10 = vrot.slane %v2421_v53, 5  ;;  %v2758_v57 = vcombine.low %v2370_v2, %v2373_v3 }
  0x60   : > { %v1883_v37 = vcombine.low %v502_v15, %v512_v50  ;;  %v1369_v24 = vrot.slane %v1368_v40, 4  ;;  %v1106_v43 = vrot.slane %v1104_v28, 4  ;;  %v1893_v41 = vcombine.low %v2395_v25, %v2398_v26 }
  0x61   : > { %v1364_v21 = vsel %vm2402_vm3, %v1359_v6, %v1363_v20  ;;  %v1049_v56 = vsel %vm2745_vm6, %v1911_v54, %v1048_v10  ;;  %v1050_v30 = vrot.slane %v1048_v10, 4  ;;  %v1105_v2 = vsel %vm2745_vm6, %v1919_v12, %v1104_v28 }
  0x62   : > { %v2767_v58 = vsel %vm755_vm0, %v1883_v37, 0  ;;  %v1374_v15 = vsel %vm2402_vm3, %v1369_v24, %v1373_v18  ;;  %v1920_v3 = vrot.slane %v2435_v62, 9  ;;  %v1108_v25 = vsel %vm2745_vm6, %v1106_v43, %v1107_v48 }
  0x63   : > { %2052 = vmatpush3.bf16.xpose.msra.mxu0 %v2767_v58  ;;  %v2775_v20 = vcombine.low %v1364_v21, %v1374_v15  ;;  %1982 = vmatpush3.bf16.xpose.msra.mxu1 %v2767_v58  ;;  %v1052_v26 = vsel %vm2745_vm6, %v1050_v30, %v1051_v52  ;;  %v1111_v63 = vrot.slane %v2443_v14, 5  ;;  %v2785_v18 = vsel %vm755_vm0, %v2418_v45, 0 }
  0x64   : > { %2167 = vmatprep.subr.msk.bf16.mxu1 %vm755_vm0, %v2758_v57  ;;  %v1928_v40 = vcombine.low %v1049_v56, %v1052_v26  ;;  %v1894_v21 = vcombine.low %v2416_v44, %v2421_v53  ;;  %v1912_v12 = vrot.slane %v2456_v23, 9  ;;  %v932_v48 = vsel %vm755_vm0, %v1893_v41, 0 }
  0x65   : > { %2198 = vmatprep.subr.msk.bf16.mxu0 %vm755_vm0, %v2775_v20  ;;  %v2797_v28 = vcombine.low %v2381_v9, %v2384_v11  ;;  %v1055_v45 = vrot.slane %v2463_v35, 5  ;;  %v1058_v54 = vrot.slane %v2467_v39, 5  ;;  %v2801_v52 = vcombine.low %v1105_v2, %v1108_v25  ;;  %v2843_v25 = vld [vmem:[%s3291_s1] sm:$0xf] }
  0x66   : > { %v1112_v44 = vsel %vm2745_vm6, %v1920_v3, %v1111_v63  ;;  %v1114_v53 = vrot.slane %v2450_v17, 5  ;;  %v1921_v50 = vrot.slane %v2477_v51, 9  ;;  %v1113_v6 = vrot.slane %v1111_v63, 4 }
  0x67   : > { %v2809_v41 = vsel %vm2745_vm6, %v1912_v12, %v1055_v45  ;;  %v1057_v9 = vrot.slane %v1055_v45, 4  ;;  %v1118_v11 = vrot.slane %v2484_v4, 5  ;;  %v2813_v10 = vsel %vm755_vm0, %v1928_v40, 0 }
  0x68   : > { %v2816_v39 = vsel %vm755_vm0, %v1894_v21, 0  ;;  %v1121_v37 = vrot.slane %v2491_v16, 5  ;;  %v1913_v17 = vrot.slane %v2495_v19, 9  ;;  %v1062_v30 = vrot.slane %v2504_v32, 5 }
  0x69   : > { %v2822_v24 = vsel %vm2745_vm6, %v1057_v9, %v1058_v54  ;;  %v1119_v43 = vsel %vm2745_vm6, %v1921_v50, %v1118_v11  ;;  %v1120_v56 = vrot.slane %v1118_v11, 4  ;;  %v2833_v16 = vcombine.low %v2435_v62, %v2443_v14 }
  0x6a   : > { %1984 = vmatmul.mubr.msk.bf16.vlgmr.msra.gmra.mrb[0].mxu1 %vm755_vm0, %v2350_v0  ;;  %v1929_v15 = vcombine.low %v2809_v41, %v2822_v24  ;;  %v1065_v2 = vrot.slane %v2515_v42, 5  ;;  %v2838_v3 = vcombine.low %v2477_v51, %v2484_v4  ;;  %v2850_v62 = vsel %vm2745_vm6, %v1913_v17, %v1062_v30  ;;  %v3357_v24 = vld [vmem:[#allocation19_spill] sm:$0xff] }
  0x6b   : > { %2054 = vmatpush3.bf16.xpose.msra.mxu0 %v2785_v18  ;;  %1986 = vmatpush3.bf16.xpose.msra.mxu1 %v932_v48  ;;  %v1122_v0 = vsel %vm2745_vm6, %v1120_v56, %v1121_v37  ;;  %v1064_v14 = vrot.slane %v1062_v30, 4  ;;  %v1922_v42 = vrot.slane %v2519_v46, 9  ;;  %v1115_v51 = vsel %vm2745_vm6, %v1113_v6, %v1114_v53 }
  0x6c   : > { %2199 = vmatprep.subr.msk.bf16.mxu0 %vm755_vm0, %v2801_v52  ;;  %2168 = vmatprep.subr.msk.bf16.mxu1 %vm755_vm0, %v2797_v28  ;;  %v2859_v4 = vcombine.low %v1119_v43, %v1122_v0  ;;  %v1125_v26 = vrot.slane %v2527_v61, 5  ;;  %v1128_v63 = vrot.slane %v2536_v13, 5  ;;  %v1896_v21 = vcombine.low %v2495_v19, %v2504_v32  ;;  %v2913_v0 = vld [vmem:[%s3291_s1 + $0x14] sm:$0xf] }
  0x6d   : > { %v2865_v40 = vsel %vm2745_vm6, %v1064_v14, %v1065_v2  ;;  %v1914_v12 = vrot.slane %v2541_v22, 9  ;;  %v1069_v48 = vrot.slane %v2552_v38, 5  ;;  %2001 = vmatprep.mubr.msk.bf16.mxu1 %vm755_vm0, %v2843_v25  ;;  %v1072_v53 = vrot.slane %v2557_v47, 5 }
  0x6e   : > { %v1930_v45 = vcombine.low %v2850_v62, %v2865_v40  ;;  %v1126_v13 = vsel %vm2745_vm6, %v1922_v42, %v1125_v26  ;;  %v1127_v54 = vrot.slane %v1125_v26, 4  ;;  %v2878_v50 = vcombine.low %v1112_v44, %v1115_v51 }
  0x6f   : > { %v2882_v6 = vsel %vm2745_vm6, %v1914_v12, %v1069_v48  ;;  %v1071_v9 = vrot.slane %v1069_v48, 4  ;;  %v2886_v11 = vcombine.low %v2519_v46, %v2527_v61  ;;  %v1895_v37 = vcombine.low %v2456_v23, %v2463_v35  ;;  %v3351_v48 = vld [vmem:[#allocation10_spill] sm:$0xff] }
  0x70   : > { %v1129_v17 = vsel %vm2745_vm6, %v1127_v54, %v1128_v63  ;;  %v1923_v43 = vrot.slane %v2568_v60, 9  ;;  %v1132_v47 = vrot.slane %v2574_v29, 5  ;;  %v1135_v30 = vrot.slane %v2579_v36, 5  ;;  %v3349_v36 = vld [vmem:[#allocation8_spill] sm:$0xff]  ;;  %v3350_v63 = vld [vmem:[#allocation9_spill] sm:$0xff] }
  0x71   : > { %v2894_v44 = vcombine.low %v1126_v13, %v1129_v17  ;;  %v2898_v56 = vsel %vm2745_vm6, %v1071_v9, %v1072_v53  ;;  %v1897_v46 = vcombine.low %v2541_v22, %v2552_v38  ;;  %v1915_v2 = vrot.slane %v2589_v49, 9  ;;  %v3352_v53 = vld [vmem:[#allocation12_spill] sm:$0xff]  ;;  %v2274_v38 = vld [vmem:[%s2367_s26 + $0x64] sm:$0xf] }
  0x72   : > { %2056 = vmatmul.mubr.msk.bf16.vlgmr.msra.gmra.mrb[0].mxu0 %vm755_vm0, %v2355_v1  ;;  %v1931_v23 = vcombine.low %v2882_v6, %v2898_v56  ;;  %v1133_v35 = vsel %vm2745_vm6, %v1923_v43, %v1132_v47  ;;  %v1134_v61 = vrot.slane %v1132_v47, 4  ;;  %v1076_v1 = vrot.slane %v2599_v5, 5  ;;  %v3353_v47 = vld [vmem:[#allocation13_spill] sm:$0xff]  ;;  %v2275_v56 = vld [vmem:[%s2367_s26 + $0x4] sm:$0xf] }
  0x73   : > { %2058 = vmatpush3.bf16.xpose.msra.mxu0 %v2813_v10  ;;  %1988 = vmatpush3.bf16.xpose.msra.mxu1 %v2816_v39  ;;  %v1079_v14 = vrot.slane %v3349_v36, 5  ;;  %v2921_v42 = vcombine.low %v2568_v60, %v2574_v29  ;;  %v2928_v51 = vsel %vm755_vm0, %v1895_v37, 0  ;;  %v1924_v12 = vrot.slane %v3350_v63, 9 }
  0x74   : > { %2200 = vmatprep.subr.msk.bf16.mxu0 %vm755_vm0, %v2878_v50  ;;  %2169 = vmatprep.subr.msk.bf16.mxu1 %vm755_vm0, %v2833_v16  ;;  %v1136_v26 = vsel %vm2745_vm6, %v1134_v61, %v1135_v30  ;;  %v1139_v13 = vrot.slane %v3351_v48, 5  ;;  %v1077_v60 = vsel %vm2745_vm6, %v1915_v2, %v1076_v1  ;;  %v1078_v29 = vrot.slane %v1076_v1, 4  ;;  %v3354_v61 = vld [vmem:[#allocation14_spill] sm:$0xff] }
  0x75   : > { %v2934_v54 = vcombine.low %v1133_v35, %v1136_v26  ;;  %v1142_v9 = vrot.slane %v3352_v53, 5  ;;  %2073 = vmatprep.mubr.msk.bf16.mxu0 %vm755_vm0, %v2913_v0  ;;  %v1898_v43 = vcombine.low %v2589_v49, %v2599_v5  ;;  %v1916_v30 = vrot.slane %v3353_v47, 9 }
  0x76   : > { %v1140_v37 = vsel %vm2745_vm6, %v1924_v12, %v1139_v13  ;;  %v1141_v17 = vrot.slane %v1139_v13, 4  ;;  %v1080_v35 = vsel %vm2745_vm6, %v1078_v29, %v1079_v14  ;;  %v1083_v2 = vrot.slane %v3354_v61, 5  ;;  %v3356_v29 = vld [vmem:[#allocation18_spill] sm:$0xff] }
  0x77   : > { %v1086_v1 = vrot.slane %v2651_v34, 5  ;;  %v2952_v36 = vcombine.low %v3350_v63, %v3351_v48  ;;  %v2958_v26 = vsel %vm755_vm0, %v1929_v15, 0  ;;  %v1932_v49 = vcombine.low %v1077_v60, %v1080_v35  ;;  %v3355_v63 = vld [vmem:[#allocation16_spill] sm:$0xff] }
  0x78   : > { %v1143_v5 = vsel %vm2745_vm6, %v1141_v17, %v1142_v9  ;;  %v1925_v14 = vrot.slane %v2662_v31, 9  ;;  %v1084_v34 = vsel %vm2745_vm6, %v1916_v30, %v1083_v2  ;;  %v1085_v13 = vrot.slane %v1083_v2, 4  ;;  %v3358_v30 = vld [vmem:[#allocation21_spill] sm:$0xff] }
  0x79   : > { %v2963_v12 = vcombine.low %v1140_v37, %v1143_v5  ;;  %v1146_v48 = vrot.slane %v3355_v63, 5  ;;  %v1149_v53 = vrot.slane %v3356_v29, 5  ;;  %v1899_v41 = vcombine.low %v3353_v47, %v3354_v61 }
  0x7a   : > { %v1917_v15 = vrot.slane %v3357_v24, 9  ;;  %v1087_v60 = vsel %vm2745_vm6, %v1085_v13, %v1086_v1  ;;  %v1090_v17 = vrot.slane %v2692_v8, 5  ;;  %v1093_v35 = vrot.slane %v3358_v30, 5 }
  0x7b   : > { %2060 = vmatpush3.bf16.xpose.msra.mxu0 %v2958_v26  ;;  %1990 = vmatpush3.bf16.xpose.msra.mxu1 %v2928_v51  ;;  %v1147_v9 = vsel %vm2745_vm6, %v1925_v14, %v1146_v48  ;;  %v1148_v37 = vrot.slane %v1146_v48, 4  ;;  %v1933_v47 = vcombine.low %v1084_v34, %v1087_v60  ;;  %v2986_v61 = vcombine.low %v2662_v31, %v3355_v63 }
  0x7c   : > { %2201 = vmatprep.subr.msk.bf16.mxu0 %vm755_vm0, %v2859_v4  ;;  %2170 = vmatprep.subr.msk.bf16.mxu1 %vm755_vm0, %v2838_v3  ;;  %v1091_v1 = vsel %vm2745_vm6, %v1917_v15, %v1090_v17  ;;  %v1092_v5 = vrot.slane %v1090_v17, 4  ;;  %v1950_v14 = vrot.slane %v2707_v55, 9  ;;  %v1432_v48 = vrot.slane %v2715_v7, 5 }
  0x7d   : > { %v1150_v2 = vsel %vm2745_vm6, %v1148_v37, %v1149_v53  ;;  %v1435_v34 = vrot.slane %v2724_v33, 5  ;;  %v3001_v31 = vsel %vm755_vm0, %v1896_v21, 0  ;;  %v1900_v29 = vcombine.low %v3357_v24, %v2692_v8  ;;  %v2279_v37 = vld [vmem:[%s2367_s26] sm:$0xf] }
  0x7e   : > { %v2993_v13 = vcombine.low %v1147_v9, %v1150_v2  ;;  %v1094_v63 = vsel %vm2745_vm6, %v1092_v5, %v1093_v35  ;;  %v3011_v53 = vsel %vm755_vm0, %v1930_v45, 0  ;;  %v1433_v33 = vsel %vm2745_vm6, %v1950_v14, %v1432_v48  ;;  %v2278_v9 = vld [vmem:[%s2367_s26 + $0x8] sm:$0x1] }
  0x7f   : > { %v1934_v15 = vcombine.low %v1091_v1, %v1094_v63  ;;  %v1434_v19 = vrot.slane %v1432_v48, 4  ;;  %v3019_v21 = vcombine.low %v2707_v55, %v2715_v7  ;;  %v3033_v62 = vsel %vm755_vm0, %v1931_v23, 0  ;;  %v2276_v23 = vld [vmem:[%s2367_s26 + $0x68] sm:$0x1] }
  0x80   : > { %v3039_v7 = vsel %vm755_vm0, %v1897_v46, 0  ;;  %v3048_v55 = vsel %vm755_vm0, %v1932_v49, 0  ;;  %v3051_v22 = vsel %vm755_vm0, %v1898_v43, 0  ;;  %v1097_v40 = vrot.slane %v2274_v38, 5  ;;  %v2277_v49 = vld [vmem:[%s2367_s26 + $0x60] sm:$0xf] }
  0x81   : > { %v1436_v32 = vsel %vm2745_vm6, %v1434_v19, %v1435_v34  ;;  %v3061_v45 = vsel %vm755_vm0, %v1933_v47, 0  ;;  %v3064_v6 = vsel %vm755_vm0, %v1899_v41, 0  ;;  %v1041_v46 = vrot.slane %v2275_v56, 5  ;;  %v3359_v38 = vld [vmem:[#allocation3_spill] sm:$0xff]  ;;  %v3361_v56 = vld [vmem:[#allocation5_spill] sm:$0xff] }
  0x82   : > { %v3023_v8 = vcombine.low %v1433_v33, %v1436_v32  ;;  %v1100_v43 = vrot.slane %v2276_v23, 5  ;;  %v1918_v24 = vrot.slane %v2277_v49, 9  ;;  %v1099_v60 = vrot.slane %v1097_v40, 4 }
  0x83   : > { %2062 = vmatpush3.bf16.xpose.msra.mxu0 %v3011_v53  ;;  %1992 = vmatpush3.bf16.xpose.msra.mxu1 %v3001_v31  ;;  %v1044_v41 = vrot.slane %v2278_v9, 5  ;;  %v1910_v17 = vrot.slane %v2279_v37, 9  ;;  %v1043_v47 = vrot.slane %v1041_v46, 4  ;;  %v3082_v2 = vsel %vm755_vm0, %v1934_v15, 0  ;;  %v1926_v15 = vld [vmem:[%s3291_s1 + $0x8] sm:$0xf] }
  0x84   : > { %2202 = vmatprep.subr.msk.bf16.mxu0 %vm755_vm0, %v2894_v44  ;;  %2171 = vmatprep.subr.msk.bf16.mxu1 %vm755_vm0, %v2886_v11  ;;  %v1098_v30 = vsel %vm2745_vm6, %v1918_v24, %v1097_v40  ;;  %v1101_v35 = vsel %vm2745_vm6, %v1099_v60, %v1100_v43  ;;  %v3085_v1 = vsel %vm755_vm0, %v1900_v29, 0  ;;  %v956_v33 = vsel %vm755_vm0, %v2758_v57, 0  ;;  %v1944_v57 = vld [vmem:[%s3291_s1 + $0xc] sm:$0xf]  ;;  %v3360_v40 = vld [vmem:[#allocation4_spill] sm:$0xff] }
  0x85   : > { %v1042_v5 = vsel %vm2745_vm6, %v1910_v17, %v1041_v46  ;;  %v1045_v14 = vsel %vm2745_vm6, %v1043_v47, %v1044_v41  ;;  %v1935_v48 = vcombine.low %v1098_v30, %v1101_v35  ;;  %v959_v32 = vsel %vm755_vm0, %v2797_v28, 0  ;;  %v3364_v46 = vld [vmem:[#allocation11_spill] sm:$0xff]  ;;  %v316_v9 = vld [vmem:[%s2367_s26 + $0xd4] sm:$0x1] }
  0x86   : > { %v1927_v34 = vcombine.low %v1042_v5, %v1045_v14  ;;  %v3369_v41 = vld [vmem:[#allocation23_spill] sm:$0xff]  ;;  %v1567_v17 = vshll.u32 %v316_v9, 16 }
  0x87   : > { %v3097_v63 = vsel %vm755_vm0, %v1935_v48, 0 }
  0x88   : > { %v1205_v29 = vsel %vm755_vm0, %v1927_v34, 0  ;;  %v1569_v35 = vrot.slane %v1567_v17, 5 }
  0x8b   : > { %2064 = vmatpush3.bf16.xpose.msra.mxu0 %v3033_v62  ;;  %1994 = vmatpush3.bf16.xpose.msra.mxu1 %v3039_v7 }
  0x8c   : > { %2203 = vmatprep.subr.msk.bf16.mxu0 %vm755_vm0, %v2934_v54  ;;  %2172 = vmatprep.subr.msk.bf16.mxu1 %vm755_vm0, %v2921_v42 }
  0x93   : > { %2066 = vmatpush3.bf16.xpose.msra.mxu0 %v3048_v55  ;;  %1996 = vmatpush3.bf16.xpose.msra.mxu1 %v3051_v22 }
  0x94   : > { %2204 = vmatprep.subr.msk.bf16.mxu0 %vm755_vm0, %v2963_v12  ;;  %2173 = vmatprep.subr.msk.bf16.mxu1 %vm755_vm0, %v2952_v36 }
  0x9b   : > { %2068 = vmatpush3.bf16.xpose.msra.mxu0 %v3061_v45  ;;  %1998 = vmatpush3.bf16.xpose.msra.mxu1 %v3064_v6 }
  0x9c   : > { %2205 = vmatprep.subr.msk.bf16.mxu0 %vm755_vm0, %v2993_v13  ;;  %2174 = vmatprep.subr.msk.bf16.mxu1 %vm755_vm0, %v2986_v61 }
  0xa3   : > { %2070 = vmatpush3.bf16.xpose.msra.mxu0 %v3082_v2  ;;  %2000 = vmatpush3.bf16.xpose.msra.mxu1 %v3085_v1 }
  0xa4   : > { %2206 = vmatprep.subr.msk.bf16.mxu0 %vm755_vm0, %v3023_v8  ;;  %2175 = vmatprep.subr.msk.bf16.mxu1 %vm755_vm0, %v1935_v48 }
  0xaa   : > { %2002 = vmatmul.mubr.msk.bf16.vlgmr.msra.gmra.mrb[0].mxu1 %vm755_vm0, %v2843_v25  ;;  %v1954_v25 = vld [vmem:[%s3291_s1 + $0x18] sm:$0xf] }
  0xab   : > { %2072 = vmatpush3.bf16.xpose.msra.mxu0 %v3097_v63  ;;  %2004 = vmatpush3.bf16.xpose.msra.mxu1 %v1205_v29 }
  0xac   : > { %2207 = vmatprep.subr.msk.bf16.mxu0 %vm755_vm0, %v2833_v16  ;;  %2176 = vmatprep.subr.msk.bf16.mxu1 %vm755_vm0, %v2801_v52 }
  0xad   : > { %2019 = vmatprep.mubr.msk.bf16.mxu1 %vm755_vm0, %v1926_v15 }
  0xb2   : > { %2074 = vmatmul.mubr.msk.bf16.vlgmr.msra.gmra.mrb[0].mxu0 %vm755_vm0, %v2913_v0  ;;  %v3157_v0 = vld [vmem:[%s2367_s26 + $0xd0] sm:$0xf] }
  0xb3   : > { %2076 = vmatpush3.bf16.xpose.msra.mxu0 %v2928_v51  ;;  %2006 = vmatpush3.bf16.xpose.msra.mxu1 %v2813_v10  ;;  %v3154_v10 = vld [vmem:[%s2367_s26 + $0xcc] sm:$0xf]  ;;  %v1561_v23 = vshrl.u32 %v3157_v0, 16  ;;  %v1557_v43 = vshll.u32 %v3157_v0, 16  ;;  %s250_s26 = scalar_lea.vmem %s3293_s3, %s1873_s23 }
  0xb4   : > { %2208 = vmatprep.subr.msk.bf16.mxu0 %vm755_vm0, %v2838_v3  ;;  %2177 = vmatprep.subr.msk.bf16.mxu1 %vm755_vm0, %v2878_v50  ;;  %v1955_v19 = vcombine.low %v3154_v10, %v3157_v0 }
  0xb5   : > { %2091 = vmatprep.mubr.msk.bf16.mxu0 %vm755_vm0, %v1954_v25  ;;  %v1559_v24 = vrot.slane %v1557_v43, 5  ;;  %v1563_v60 = vrot.slane %v1561_v23, 4 }
  0xb7   : > { %v1564_v37 = vor.u32 %v1563_v60, %v1559_v24 }
  0xb9   : > { %v1565_v30 = vrot.slane %v1564_v37, 4 }
  0xbb   : > { %2078 = vmatpush3.bf16.xpose.msra.mxu0 %v3001_v31  ;;  %2008 = vmatpush3.bf16.xpose.msra.mxu1 %v2958_v26 }
  0xbc   : > { %2209 = vmatprep.subr.msk.bf16.mxu0 %vm755_vm0, %v2886_v11  ;;  %2178 = vmatprep.subr.msk.bf16.mxu1 %vm755_vm0, %v2859_v4 }
  0xc3   : > { %2080 = vmatpush3.bf16.xpose.msra.mxu0 %v3039_v7  ;;  %2010 = vmatpush3.bf16.xpose.msra.mxu1 %v3011_v53 }
  0xc4   : > { %2210 = vmatprep.subr.msk.bf16.mxu0 %vm755_vm0, %v2921_v42  ;;  %2179 = vmatprep.subr.msk.bf16.mxu1 %vm755_vm0, %v2894_v44 }
  0xcb   : > { %2082 = vmatpush3.bf16.xpose.msra.mxu0 %v3051_v22  ;;  %2012 = vmatpush3.bf16.xpose.msra.mxu1 %v3033_v62 }
  0xcc   : > { %2211 = vmatprep.subr.msk.bf16.mxu0 %vm755_vm0, %v2952_v36  ;;  %2180 = vmatprep.subr.msk.bf16.mxu1 %vm755_vm0, %v2934_v54 }
  0xd3   : > { %2084 = vmatpush3.bf16.xpose.msra.mxu0 %v3064_v6  ;;  %2014 = vmatpush3.bf16.xpose.msra.mxu1 %v3048_v55 }
  0xd4   : > { %2212 = vmatprep.subr.msk.bf16.mxu0 %vm755_vm0, %v2986_v61  ;;  %2181 = vmatprep.subr.msk.bf16.mxu1 %vm755_vm0, %v2963_v12 }
  0xdb   : > { %2086 = vmatpush3.bf16.xpose.msra.mxu0 %v3085_v1  ;;  %2016 = vmatpush3.bf16.xpose.msra.mxu1 %v3061_v45 }
  0xdc   : > { %2213 = vmatprep.subr.msk.bf16.mxu0 %vm755_vm0, %v3019_v21  ;;  %2182 = vmatprep.subr.msk.bf16.mxu1 %vm755_vm0, %v2993_v13 }
  0xe3   : > { %2088 = vmatpush3.bf16.xpose.msra.mxu0 %v956_v33  ;;  %2018 = vmatpush3.bf16.xpose.msra.mxu1 %v3082_v2 }
  0xe4   : > { %2214 = vmatprep.subr.msk.bf16.mxu0 %vm755_vm0, %v1955_v19  ;;  %2183 = vmatprep.subr.msk.bf16.mxu1 %vm755_vm0, %v2797_v28  ;;  %v1957_v28 = vld [vmem:[%s3291_s1 + $0x1c] sm:$0xf] }
  0xea   : > { %2020 = vmatmul.mubr.msk.bf16.vlgmr.msra.gmra.mrb[0].mxu1 %vm755_vm0, %v1926_v15 }
  0xeb   : > { %2090 = vmatpush3.bf16.xpose.msra.mxu0 %v959_v32  ;;  %2022 = vmatpush3.bf16.xpose.msra.mxu1 %v2816_v39  ;;  %v3362_v39 = vld [vmem:[#allocation6_spill] sm:$0xff] }
  0xec   : > { %2215 = vmatprep.subr.msk.bf16.mxu0 %vm755_vm0, %v3359_v38  ;;  %2184 = vmatprep.subr.msk.bf16.mxu1 %vm755_vm0, %v2833_v16  ;;  %v3363_v16 = vld [vmem:[#allocation7_spill] sm:$0xff] }
  0xed   : > { %2037 = vmatprep.mubr.msk.bf16.mxu1 %vm755_vm0, %v1944_v57 }
  0xf2   : > { %2092 = vmatmul.mubr.msk.bf16.vlgmr.msra.gmra.mrb[0].mxu0 %vm755_vm0, %v1954_v25 }
  0xf3   : > { %2094 = vmatpush3.bf16.xpose.msra.mxu0 %v3360_v40  ;;  %2024 = vmatpush3.bf16.xpose.msra.mxu1 %v2928_v51  ;;  %v3365_v51 = vld [vmem:[#allocation15_spill] sm:$0xff] }
  0xf4   : > { %2216 = vmatprep.subr.msk.bf16.mxu0 %vm755_vm0, %v3361_v56  ;;  %2185 = vmatprep.subr.msk.bf16.mxu1 %vm755_vm0, %v2838_v3  ;;  %v3366_v3 = vld [vmem:[#allocation17_spill] sm:$0xff] }
  0xf5   : > { %2109 = vmatprep.mubr.msk.bf16.mxu0 %vm755_vm0, %v1957_v28 }
  0xfb   : > { %2096 = vmatpush3.bf16.xpose.msra.mxu0 %v3362_v39  ;;  %2026 = vmatpush3.bf16.xpose.msra.mxu1 %v3001_v31  ;;  %v3367_v31 = vld [vmem:[#allocation20_spill] sm:$0xff] }
  0xfc   : > { %2217 = vmatprep.subr.msk.bf16.mxu0 %vm755_vm0, %v3363_v16  ;;  %2186 = vmatprep.subr.msk.bf16.mxu1 %vm755_vm0, %v2886_v11  ;;  %v1548_v11 = vshrl.u32 %v3154_v10, 16 }
  0xfe   : > { %v1550_v49 = vrot.slane %v1548_v11, 4 }
 0x103   : > { %2098 = vmatpush3.bf16.xpose.msra.mxu0 %v3364_v46  ;;  %2028 = vmatpush3.bf16.xpose.msra.mxu1 %v3039_v7  ;;  %v1551_v7 = vshll.u32 %v3154_v10, 16 }
 0x104   : > { %2218 = vmatprep.subr.msk.bf16.mxu0 %vm755_vm0, %v3365_v51  ;;  %2187 = vmatprep.subr.msk.bf16.mxu1 %vm755_vm0, %v2921_v42 }
 0x105   : > { %v1553_v42 = vrot.slane %v1551_v7, 5 }
 0x10b   : > { %2100 = vmatpush3.bf16.xpose.msra.mxu0 %v3366_v3  ;;  %2030 = vmatpush3.bf16.xpose.msra.mxu1 %v3051_v22  ;;  %v3368_v22 = vld [vmem:[#allocation22_spill] sm:$0xff] }
 0x10c   : > { %2219 = vmatprep.subr.msk.bf16.mxu0 %vm755_vm0, %v3367_v31  ;;  %2188 = vmatprep.subr.msk.bf16.mxu1 %vm755_vm0, %v2952_v36  ;;  %v1554_v36 = vor.u32 %v1553_v42, %v1550_v49 }
 0x10e   : > { %v1555_v47 = vrot.slane %v1554_v36, 4 }
 0x113   : > { %2102 = vmatpush3.bf16.xpose.msra.mxu0 %v3368_v22  ;;  %2032 = vmatpush3.bf16.xpose.msra.mxu1 %v3064_v6  ;;  %v1560_v6 = vsel %vm2402_vm3, %v1555_v47, %v1559_v24 }
 0x114   : > { %2220 = vmatprep.subr.msk.bf16.mxu0 %vm755_vm0, %v3369_v41  ;;  %2189 = vmatprep.subr.msk.bf16.mxu1 %vm755_vm0, %v2986_v61  ;;  %v1570_v61 = vsel %vm2402_vm3, %v1565_v30, %v1569_v35 }
 0x115   : > { %v1958_v5 = vcombine.low %v1560_v6, %v1570_v61 }
 0x11b   : > { %2104 = vmatpush3.bf16.xpose.msra.mxu0 %v2767_v58  ;;  %2034 = vmatpush3.bf16.xpose.msra.mxu1 %v3085_v1  ;;  %v3370_v58 = vld [vmem:[#allocation2_spill] sm:$0xff] }
 0x11c   : > { %2221 = vmatprep.subr.msk.bf16.mxu0 %vm755_vm0, %v2775_v20  ;;  %2190 = vmatprep.subr.msk.bf16.mxu1 %vm755_vm0, %v3019_v21  ;;  %v787_v1 = vsel %vm755_vm0, %v3370_v58, 0  ;;  %v1628_v20 = vrot.slane %v3157_v0, 5 }
 0x123   : > { %2106 = vmatpush3.bf16.xpose.msra.mxu0 %v2785_v18  ;;  %2036 = vmatpush3.bf16.xpose.msra.mxu1 %v956_v33  ;;  %v1960_v18 = vrot.slane %v3154_v10, 9 }
 0x124   : > { %2222 = vmatprep.subr.msk.bf16.mxu0 %vm755_vm0, %v1958_v5 }
 0x12a   : > { %2038 = vmatmul.mubr.msk.bf16.vlgmr.msra.gmra.mrb[0].mxu1 %vm755_vm0, %v1944_v57 }
 0x12b   : > { %2108 = vmatpush3.bf16.xpose.msra.mxu0 %v787_v1 }
 0x12c   : > { %2223 = vmatprep.subr.msk.bf16.mxu0 %vm755_vm0, %v2878_v50  ;;  %v1631_v50 = vrot.slane %v316_v9, 5 }
 0x132   : > { %2110 = vmatmul.mubr.msk.bf16.vlgmr.msra.gmra.mrb[0].mxu0 %vm755_vm0, %v1957_v28 }
 0x133   : > { %2112 = vmatpush3.bf16.xpose.msra.mxu0 %v2958_v26  ;;  %2127 = vmatprep.mubr.msk.bf16.mxu0 %vm755_vm0, %v1961_v27 }
 0x134   : > { %2224 = vmatprep.subr.msk.bf16.mxu0 %vm755_vm0, %v2859_v4  ;;  %v1630_v4 = vrot.slane %v1628_v20, 4 }
 0x13b   : > { %2114 = vmatpush3.bf16.xpose.msra.mxu0 %v3011_v53 }
 0x13c   : > { %2225 = vmatprep.subr.msk.bf16.mxu0 %vm755_vm0, %v2894_v44  ;;  %v1629_v44 = vsel %vm2745_vm6, %v1960_v18, %v1628_v20 }
 0x143   : > { %2116 = vmatpush3.bf16.xpose.msra.mxu0 %v3033_v62 }
 0x144   : > { %2226 = vmatprep.subr.msk.bf16.mxu0 %vm755_vm0, %v2934_v54  ;;  %v1632_v54 = vsel %vm2745_vm6, %v1630_v4, %v1631_v50 }
 0x145   : > { %v1962_v26 = vcombine.low %v1629_v44, %v1632_v54 }
 0x14b   : > { %2118 = vmatpush3.bf16.xpose.msra.mxu0 %v3048_v55 }
 0x14c   : > { %2227 = vmatprep.subr.msk.bf16.mxu0 %vm755_vm0, %v2963_v12  ;;  %v1232_v12 = vsel %vm755_vm0, %v2801_v52, 0 }
 0x153   : > { %2120 = vmatpush3.bf16.xpose.msra.mxu0 %v3061_v45 }
 0x154   : > { %2228 = vmatprep.subr.msk.bf16.mxu0 %vm755_vm0, %v2993_v13 }
 0x15b   : > { %2122 = vmatpush3.bf16.xpose.msra.mxu0 %v3082_v2 }
 0x15c   : > { %2229 = vmatprep.subr.msk.bf16.mxu0 %vm755_vm0, %v3023_v8 }
 0x163   : > { %2124 = vmatpush3.bf16.xpose.msra.mxu0 %v3097_v63 }
 0x164   : > { %2230 = vmatprep.subr.msk.bf16.mxu0 %vm755_vm0, %v1962_v26 }
 0x16b   : > { %2126 = vmatpush3.bf16.xpose.msra.mxu0 %v1232_v12 }
 0x172   : > { %2128 = vmatmul.mubr.msk.bf16.vlgmr.msra.gmra.mrb[0].mxu0 %vm755_vm0, %v1961_v27 }
 0x1fd   : > { %v1342_v13 = vpop.f32.mrb[0].mxu1 }
 0x1fe   : > { %v1344_v53 = vpop.f32.mrb[1].mxu1 }
 0x1ff   : > { %v1346_v21 = vpop.f32.mrb[2].mxu1 }
 0x200   : > { %v1347_v8 = vpop.f32.mrb[3].mxu1 }
 0x245   : > { %v1678_v59 = vpop.f32.mrb[0].mxu0 }
 0x246   : > { %v2129_v62 = vadd.f32 %v1678_v59, %v1342_v13  ;;  %v1680_v55 = vpop.f32.mrb[1].mxu0 }
 0x247   : > { %v2130_v45 = vadd.f32 %v1680_v55, %v1344_v53  ;;  %v1682_v2 = vpop.f32.mrb[2].mxu0 }
 0x248   : > { %1687 = vst [vmem:[%s242_s22] sm:$0xff] %v2129_v62  ;;  %v1683_v52 = vpop.f32.mrb[3].mxu0  ;;  %v1694_v14 = vmul.f32 %v2129_v62, %v2129_v62 }
 0x249   : > { %1688 = vst [vmem:[%s242_s22 + $0x8] sm:$0xff] %v2130_v45  ;;  %v1689_v48 = vadd.f32 %v2130_v45, %v2129_v62  ;;  %v1695_v34 = vmul.f32 %v2130_v45, %v2130_v45 }
 0x24b   : > { %1690 = vadd.xlane.f32.xlu0 %v1689_v48  ;;  %v1696_v63 = vadd.f32 %v1695_v34, %v1694_v14 }
 0x24f   : > { %1697 = vadd.xlane.f32.xlu0 %v1696_v63 }
 0x2d8   : > { %v1691_v29 = vpop.xlane.xlu0 %1690 }
 0x2d9   : > { %1693 = vst.msk [vmem:[%s250_s26] sm:$0xff] %vm1692_vm7, %v1691_v29 }
 0x2dc   : > { %v1698_v15 = vpop.xlane.xlu0 %1697 }
 0x2dd   : > { %1699 = vst.msk [vmem:[%s257_s29] sm:$0xff] %vm1692_vm7, %v1698_v15 }
 0x2de PF: > { %s15_s17 = sadd.s32 1, %s2302_s17   ;;  %s3371_s15 = smov %s2298_s16 }
 0x2df   : > { %p12_p5 = scmp.ge.s32.totalorder %s15_s17, 4   ;;  %s3372_s16 = smov %s3374_s18 }
 0x2e1   :  { %14 = sbr.rel (!%p12_p5) target bundleno = 2 (0x2), region = 91 }

</bundles_post_ra>
